<compile_context>
chip_gen: v7x
topology: tpu7x:2x2x1
jax: 0.10.0
libtpu: 0.0.40
codegen_flags: <defaults>
</compile_context>

<pallas_src>
import functools

import jax
import jax.numpy as jnp
from jax.experimental import pallas as pl
from jax.experimental.pallas import tpu as pltpu

EPS = 1e-5
LANE = 128
MXU_DIM = 256          # MXU-aligned M tiles (multiple of 128, so also fine on v5e)


def _round_up(x, m):
    return ((x + m - 1) // m) * m


def _vmem_config():
    """Per-generation scoped-VMEM limit and tiling budget (review: don't size
    v5e/v6e's 128 MiB VMEM with a v7x-sized 32/20 MiB cap)."""
    cap = 64 * 1024 * 1024
    try:
        cap = int(pltpu.get_tpu_info().vmem_capacity_bytes)
    except Exception:
        pass
    limit = max(32 << 20, min(cap * 3 // 4, 96 << 20))
    budget = max(20 << 20, min(cap // 2, 64 << 20))
    return limit, budget


VMEM_LIMIT, VMEM_BUDGET = _vmem_config()


# --------------------------------------------------------------------------- kernels
def _make_conv_stats_kernel(nstreams):
    """Pass 1: for each stream s, conv as ONE folded MXU matmul
    (tile_m, K_s) @ (K_s, Cp) -> f32 acc (stored bf16), plus per-channel
    sum / sum-of-squares partials accumulated across the (arbitrary) M-tile axis
    into this parallel-slice's (8, Cp) accumulator block."""

    def kernel(*refs):
        in_refs, out_refs = refs[: 2 * nstreams], refs[2 * nstreams:]

        @pl.when(pl.program_id(1) == 0)
        def _init():
            for s in range(nstreams):
                out_refs[3 * s + 1][...] = jnp.zeros_like(out_refs[3 * s + 1])
                out_refs[3 * s + 2][...] = jnp.zeros_like(out_refs[3 * s + 2])

        for s in range(nstreams):
            a_ref, w_ref = in_refs[2 * s], in_refs[2 * s + 1]
            o_ref, sum_ref, ssq_ref = out_refs[3 * s: 3 * s + 3]
            acc = jnp.dot(a_ref[...], w_ref[...],
                          preferred_element_type=jnp.float32)      # bf16 in, f32 acc
            o_ref[...] = acc.astype(o_ref.dtype)                    # bf16 store
            tm, cpd = acc.shape
            part = acc.reshape(tm // 8, 8, cpd)                     # sublane-group partials
            sum_ref[...] += jnp.sum(part, axis=0)                   # (8, Cp) f32
            ssq_ref[...] += jnp.sum(part * part, axis=0)

    return kernel


def _make_bn_finalize_kernel(mode, inv_count, relu):
    """Pass 2: fused scale/shift BatchNorm (+ bn/identity residual) (+ ReLU).
    Stats refs hold (ncores*8, Cp) partial rows; fold them here."""

    def bn(x, s, q, g, b):
        tot = jnp.sum(s, axis=0, keepdims=True)                     # fold cores+sublanes
        totsq = jnp.sum(q, axis=0, keepdims=True)
        mean = tot * inv_count
        var = jnp.maximum(totsq * inv_count - mean * mean, 0.0)     # f32, clamped
        scale = g * jax.lax.rsqrt(var + EPS)
        shift = b - mean * scale
        return x.astype(jnp.float32) * scale + shift

    def kernel(*refs):
        if mode == "bn_residual":
            (x_ref, s_ref, q_ref, g_ref, b_ref,
             xd_ref, sd_ref, qd_ref, gd_ref, bd_ref, o_ref) = refs
        elif mode == "identity_residual":
            x_ref, s_ref, q_ref, g_ref, b_ref, id_ref, o_ref = refs
        else:  # "none"
            x_ref, s_ref, q_ref, g_ref, b_ref, o_ref = refs

        out = bn(x_ref[...], s_ref[...], q_ref[...], g_ref[...], b_ref[...])
        if mode == "bn_residual":
            out = out + bn(xd_ref[...], sd_ref[...], qd_ref[...],
                           gd_ref[...], bd_ref[...])
        elif mode == "identity_residual":
            out = out + id_ref[...].astype(jnp.float32)
        if relu:
            out = jnp.maximum(out, 0.0)
        o_ref[...] = out.astype(o_ref.dtype)

    return kernel


# --------------------------------------------------------------------- pallas wrappers
def _conv_stats_call(streams, tile_m, cp, ncores):
    """streams: list of (A:(Mp,K) bf16, W:(K,Cp) bf16).  Returns per stream
    (conv_out:(Mp,Cp) bf16, sum:(ncores*8,Cp) f32, sumsq:(ncores*8,Cp) f32)."""
    mp = streams[0][0].shape[0]
    ntiles = mp // tile_m
    tpc = ntiles // ncores
    grid = (ncores, tpc)                       # ("parallel", "arbitrary")

    def act_map(p, i):
        return (p * tpc + i, 0)

    def wgt_map(p, i):                         # constant block index -> held resident
        return (0, 0)

    def acc_map(p, i):                         # per-parallel-slice accumulator block
        return (p, 0)

    in_specs, args, out_shapes, out_specs = [], [], [], []
    flops, bytes_acc = 0, 0
    for a, w in streams:
        k = a.shape[1]
        in_specs += [pl.BlockSpec((tile_m, k), act_map),
                     pl.BlockSpec((k, cp), wgt_map)]
        args += [a, w]
        out_shapes += [jax.ShapeDtypeStruct((mp, cp), jnp.bfloat16),
                       jax.ShapeDtypeStruct((ncores * 8, cp), jnp.float32),
                       jax.ShapeDtypeStruct((ncores * 8, cp), jnp.float32)]
        out_specs += [pl.BlockSpec((tile_m, cp), act_map),
                      pl.BlockSpec((8, cp), acc_map),
                      pl.BlockSpec((8, cp), acc_map)]
        flops += 2 * mp * k * cp
        bytes_acc += int(a.size) * 2 + int(w.size) * 2 + mp * cp * 2 + 2 * ncores * 8 * cp * 4
    return pl.pallas_call(
        _make_conv_stats_kernel(len(streams)),
        grid=grid,
        in_specs=in_specs,
        out_specs=tuple(out_specs),
        out_shape=tuple(out_shapes),
        compiler_params=pltpu.CompilerParams(
            dimension_semantics=("parallel", "arbitrary"),   # megacore over M on v7x
            vmem_limit_bytes=VMEM_LIMIT),
        cost_estimate=pl.CostEstimate(flops=int(flops), transcendentals=0,
                                      bytes_accessed=int(bytes_acc)),
    )(*args)


def _bn_finalize_call(mode, x, s, q, g, b, extra, tile_m, cp, inv_count,
                      relu, out_dtype):
    mp = x.shape[0]
    grid = (mp // tile_m,)

    def tile_spec():
        return pl.BlockSpec((tile_m, cp), lambda i: (i, 0))

    def const_spec(arr):
        return pl.BlockSpec(arr.shape, lambda i: (0, 0))

    args = [x, s, q, g, b]
    in_specs = [tile_spec(), const_spec(s), const_spec(q), const_spec(g), const_spec(b)]
    if mode == "bn_residual":
        xd, sd, qd, gd, bd = extra
        args += [xd, sd, qd, gd, bd]
        in_specs += [tile_spec(), const_spec(sd), const_spec(qd),
                     const_spec(gd), const_spec(bd)]
    elif mode == "identity_residual":
        args += list(extra)
        in_specs += [tile_spec()]

    bytes_acc = int(sum(int(v.size) * v.dtype.itemsize for v in args)
                    + mp * cp * jnp.dtype(out_dtype).itemsize)
    return pl.pallas_call(
        _make_bn_finalize_kernel(mode, inv_count, relu),
        grid=grid,
        in_specs=in_specs,
        out_specs=pl.BlockSpec((tile_m, cp), lambda i: (i, 0)),
        out_shape=jax.ShapeDtypeStruct((mp, cp), out_dtype),
        compiler_params=pltpu.CompilerParams(
            dimension_semantics=("parallel",),       # shard M-tiles across TCs (v7x)
            vmem_limit_bytes=VMEM_LIMIT),
        cost_estimate=pl.CostEstimate(
            flops=int(12 * mp * cp),
            transcendentals=int((mp // tile_m) * cp * (2 if mode == "bn_residual" else 1)),
            bytes_accessed=bytes_acc),
    )(*args)


# ------------------------------------------------------------------------- host glue
def _im2col(x_nhwc, ksize, stride, pad):
    """Folded im2col: (N,H,W,C) -> (N*Ho*Wo, K*K*C).  Pure data movement (XLA).
    TODO(synk): replace with in-kernel tap formation from haloed spatial blocks."""
    n, h, w, c = x_nhwc.shape
    ho = (h + 2 * pad - ksize) // stride + 1
    wo = (w + 2 * pad - ksize) // stride + 1
    xp = jnp.pad(x_nhwc, ((0, 0), (pad, pad), (pad, pad), (0, 0)))
    cols = []
    for dy in range(ksize):
        for dx in range(ksize):
            cols.append(jax.lax.slice(
                xp, (0, dy, dx, 0),
                (n, dy + (ho - 1) * stride + 1, dx + (wo - 1) * stride + 1, c),
                (1, stride, stride, 1)))
    a = jnp.stack(cols, axis=3)                      # (N,Ho,Wo,KK,C): tap-major, C minor
    return a.reshape(n * ho * wo, ksize * ksize * c), (n, ho, wo)


def _fold_weight(w_oihw, cp):
    """PyTorch OIHW -> (KK*Cin, Cp) bf16, matching the im2col column ordering."""
    cout, cin, kh, kw = w_oihw.shape
    w = jnp.transpose(w_oihw, (2, 3, 1, 0)).reshape(kh * kw * cin, cout)
    return jnp.pad(w, ((0, 0), (0, cp - cout))).astype(jnp.bfloat16)


def _pad_rows(a, mp):
    return jnp.pad(a, ((0, mp - a.shape[0]), (0, 0)))


def _pad_cols(a, cp):
    return jnp.pad(a, ((0, 0), (0, cp - a.shape[1])))


def _pick_tile_m(m, stage_ks, cp, budget, cap=2048):
    """Largest MXU-aligned M-tile whose double-buffered working set fits the
    per-generation VMEM budget.  Weights (constant index_map) counted as resident."""
    def footprint(tm):
        worst = 0
        for ks in stage_ks:
            act = sum(2 * tm * k * 2 for k in ks)        # bf16 activation tiles, x2 buffers
            out = len(ks) * 2 * tm * cp * 2              # bf16 conv-out tiles, x2 buffers
            wgt = sum(k * cp * 2 for k in ks)            # resident weight blocks
            sts = len(ks) * 2 * 2 * 8 * cp * 4           # stats accumulator blocks
            worst = max(worst, act + out + wgt + sts)
        return worst + (2 << 20)
    align = MXU_DIM if m >= MXU_DIM else 8
    tile = min(_round_up(m, align), _round_up(cap, align))
    while tile > align and footprint(tile) > budget:
        tile -= align
    while tile > 8 and footprint(tile) > budget:
        tile = max(8, _round_up(tile // 2, 8))
    return max(8, tile)


# ----------------------------------------------------------------------------- forward
@functools.partial(jax.jit,
                   static_argnames=("stride", "tile_m", "channels_last", "out_dtype"))
def residual_block_forward(x, params, stride, tile_m=None, channels_last=False,
                           out_dtype=jnp.float32):
    """Pallas ResidualBlock.forward.
    x: (N, Cin, H, W) (default) or (N, H, W, Cin) if channels_last=True."""
    xh = x if channels_last else jnp.transpose(x, (0, 2, 3, 1))
    xh = xh.astype(jnp.float32)
    n, h, w, cin = xh.shape
    cout = params["w1"].shape[0]
    cp = _round_up(cout, LANE)            # lane-dense channel padding
    has_ds = "wd" in params
    if not has_ds:
        assert stride == 1 and cin == cout, "identity path requires stride=1 and cin==cout"

    # -------------------------------------------- stage A: conv1 + bn1 + relu
    a1, (_, ho, wo) = _im2col(xh, 3, stride, 1)       # (M, 9*Cin)
    m = n * ho * wo
    if tile_m is None:
        stage_b_ks = [9 * cout] + ([cin] if has_ds else [])
        tile_m = _pick_tile_m(m, [[9 * cin], stage_b_ks], cp, VMEM_BUDGET)
    tile_m = _round_up(tile_m, 8)
    mp = _round_up(m, tile_m)
    ntiles = mp // tile_m
    ncores = 2 if (ntiles >= 2 and ntiles % 2 == 0) else 1   # megacore-shardable pass 1
    inv_m = 1.0 / float(m)                            # zero-padded rows excluded from stats

    a1 = _pad_rows(a1, mp).astype(jnp.bfloat16)
    w1 = _fold_weight(params["w1"], cp)
    conv1, s1, q1 = _conv_stats_call([(a1, w1)], tile_m, cp, ncores)
    g1 = _pad_cols(params["g1"].reshape(1, -1).astype(jnp.float32), cp)
    b1 = _pad_cols(params["b1"].reshape(1, -1).astype(jnp.float32), cp)
    out1 = _bn_finalize_call("none", conv1, s1, q1, g1, b1, (), tile_m, cp,
                             inv_m, relu=True, out_dtype=jnp.bfloat16)

    # --------------------- stage B: conv2 + bn2 (+ fused downsample) + add + relu
    out1_img = out1[:m, :cout].reshape(n, ho, wo, cout)
    a2, _ = _im2col(out1_img, 3, 1, 1)                # (M, 9*Cout) bf16
    a2 = _pad_rows(a2, mp)
    w2 = _fold_weight(params["w2"], cp)
    streams = [(a2, w2)]
    if has_ds:
        d, _ = _im2col(xh, 1, stride, 0)              # 1x1-conv taps = strided x
        streams.append((_pad_rows(d, mp).astype(jnp.bfloat16),
                        _fold_weight(params["wd"], cp)))
    stats = _conv_stats_call(streams, tile_m, cp, ncores)

    g2 = _pad_cols(params["g2"].reshape(1, -1).astype(jnp.float32), cp)
    b2 = _pad_cols(params["b2"].reshape(1, -1).astype(jnp.float32), cp)
    if has_ds:
        conv2, s2, q2, convd, sd, qd = stats
        gd = _pad_cols(params["gd"].reshape(1, -1).astype(jnp.float32), cp)
        bd = _pad_cols(params["bd"].reshape(1, -1).astype(jnp.float32), cp)
        out = _bn_finalize_call("bn_residual", conv2, s2, q2, g2, b2,
                                (convd, sd, qd, gd, bd), tile_m, cp,
                                inv_m, relu=True, out_dtype=out_dtype)
    else:
        conv2, s2, q2 = stats
        ident = _pad_cols(_pad_rows(xh.reshape(m, cin), mp), cp).astype(jnp.bfloat16)
        out = _bn_finalize_call("identity_residual", conv2, s2, q2, g2, b2,
                                (ident,), tile_m, cp,
                                inv_m, relu=True, out_dtype=out_dtype)

    out = out[:m, :cout].reshape(n, ho, wo, cout)
    if channels_last:
        return out
    return jnp.transpose(out, (0, 3, 1, 2))           # NHWC -> NCHW


# --------------------------------------------------------------------------- reference
def _conv_ref(x, w, stride, pad, mm_dtype):
    if mm_dtype is not None:
        x, w = x.astype(mm_dtype), w.astype(mm_dtype)
    return jax.lax.conv_general_dilated(
        x, w, (stride, stride), ((pad, pad), (pad, pad)),
        dimension_numbers=("NCHW", "OIHW", "NCHW"),
        preferred_element_type=jnp.float32)


def _bn_ref(x, g, b, store_dtype=None):
    """BN with stats from the f32 conv, applied (scale/shift form) to the
    store_dtype-rounded conv — models the kernel's bf16 intermediate storage."""
    mean = jnp.mean(x, axis=(0, 2, 3), keepdims=True)
    var = jnp.mean((x - mean) ** 2, axis=(0, 2, 3), keepdims=True)
    scale = g.reshape(1, -1, 1, 1) * jax.lax.rsqrt(var + EPS)
    shift = b.reshape(1, -1, 1, 1) - mean * scale
    xq = x if store_dtype is None else x.astype(store_dtype).astype(jnp.float32)
    return xq * scale + shift


def residual_block_reference(x, params, stride, mm_dtype=None):
    """Pure-JAX reference.  mm_dtype=bf16 reproduces the kernel's MXU input precision
    and bf16 intermediate storage (f32 accumulation); mm_dtype=None is full-f32
    PyTorch training-forward semantics."""
    out = jax.nn.relu(_bn_ref(_conv_ref(x, params["w1"], stride, 1, mm_dtype),
                              params["g1"], params["b1"], mm_dtype))
    if mm_dtype is not None:
        out = out.astype(mm_dtype).astype(jnp.float32)   # kernel stores out1 in bf16
    out = _bn_ref(_conv_ref(out, params["w2"], 1, 1, mm_dtype),
                  params["g2"], params["b2"], mm_dtype)
    if "wd" in params:
        identity = _bn_ref(_conv_ref(x, params["wd"], stride, 0, mm_dtype),
                           params["gd"], params["bd"], mm_dtype)
    else:
        identity = x if mm_dtype is None else x.astype(mm_dtype).astype(jnp.float32)
    return jax.nn.relu(out + identity)


# --------------------------------------------------------------------------------- main
def _make_params(key, cin, cout, with_ds):
    ks = jax.random.split(key, 9)
    p = {
        "w1": 0.1 * jax.random.normal(ks[0], (cout, cin, 3, 3), jnp.float32),
        "g1": 1.0 + 0.1 * jax.random.normal(ks[1], (cout,), jnp.float32),
        "b1": 0.1 * jax.random.normal(ks[2], (cout,), jnp.float32),
        "w2": 0.1 * jax.random.normal(ks[3], (cout, cout, 3, 3), jnp.float32),
        "g2": 1.0 + 0.1 * jax.random.normal(ks[4], (cout,), jnp.float32),
        "b2": 0.1 * jax.random.normal(ks[5], (cout,), jnp.float32),
    }
    if with_ds:
        p.update({
            "wd": 0.1 * jax.random.normal(ks[6], (cout, cin, 1, 1), jnp.float32),
            "gd": 1.0 + 0.1 * jax.random.normal(ks[7], (cout,), jnp.float32),
            "bd": 0.1 * jax.random.normal(ks[8], (cout,), jnp.float32),
        })
    return p


def _check(out, x, params, stride):
    ref_match = residual_block_reference(x, params, stride, jnp.bfloat16)  # same precision
    ref_f32 = residual_block_reference(x, params, stride, None)           # PyTorch f32
    err_m = float(jnp.max(jnp.abs(out - ref_match)))
    err_f = float(jnp.max(jnp.abs(out - ref_f32)))
    assert jnp.allclose(out, ref_match, rtol=5e-3, atol=5e-3), err_m
    assert jnp.allclose(out, ref_f32, rtol=1e-1, atol=1e-1), err_f


if __name__ == "__main__":
    key = jax.random.PRNGKey(0)
    k_ds, k_id, kx1, kx2 = jax.random.split(key, 4)

    # downsample path: stride 2, cin != cout (tile_m=64 => 2 M-tiles => the pass-1
    # grid becomes (2 cores, 1 tile): exercises the parallel stats accumulators,
    # the cross-tile fold in finalize, and both pallas passes per stage)
    n, cin, cout, hw, stride = 2, 4, 8, 16, 2
    params = _make_params(k_ds, cin, cout, with_ds=True)
    x = jax.random.normal(kx1, (n, cin, hw, hw), jnp.float32)
    out = jax.block_until_ready(
        residual_block_forward(x, params, stride=stride, tile_m=64))
    assert out.shape == (n, cout, hw // stride, hw // stride), out.shape
    _check(out, x, params, stride)

    # identity path: stride 1, cin == cout (exercises the fused identity-residual kernel)
    n2, c2, hw2 = 2, 8, 8
    params_id = _make_params(k_id, c2, c2, with_ds=False)
    x2 = jax.random.normal(kx2, (n2, c2, hw2, hw2), jnp.float32)
    out2 = jax.block_until_ready(
        residual_block_forward(x2, params_id, stride=1, tile_m=64))
    assert out2.shape == (n2, c2, hw2, hw2), out2.shape
    _check(out2, x2, params_id, 1)

    print("KERNEL_OK")
</pallas_src>

<mosaic_0001>
module attributes {stable_mosaic.version = 11 : i64} {
  func.func @kernel(%arg0: i32, %arg1: memref<64x128xbf16, #tpu.memory_space<vmem>>, %arg2: memref<16x128xf32, #tpu.memory_space<vmem>>, %arg3: memref<16x128xf32, #tpu.memory_space<vmem>>, %arg4: memref<1x128xf32, #tpu.memory_space<vmem>>, %arg5: memref<1x128xf32, #tpu.memory_space<vmem>>, %arg6: memref<64x128xbf16, #tpu.memory_space<vmem>>) attributes {dimension_semantics = [#tpu.dimension_semantics<parallel>], iteration_bounds = array<i64: 2>, scalar_prefetch = 0 : i64, scratch_operands = 0 : i64, tpu.core_type = #tpu.core_type<tc>, window_params = [{transform_indices = @transform_0, window_bounds = array<i64: 64, 128>}, {pipeline_mode = #tpu.pipeline_mode<synchronous>, transform_indices = @transform_1, window_bounds = array<i64: 16, 128>}, {pipeline_mode = #tpu.pipeline_mode<synchronous>, transform_indices = @transform_2, window_bounds = array<i64: 16, 128>}, {pipeline_mode = #tpu.pipeline_mode<synchronous>, transform_indices = @transform_3, window_bounds = array<i64: 1, 128>}, {pipeline_mode = #tpu.pipeline_mode<synchronous>, transform_indices = @transform_4, window_bounds = array<i64: 1, 128>}, {transform_indices = @transform_5, window_bounds = array<i64: 64, 128>}]} {
    %c0 = arith.constant 0 : index
    %c0_0 = arith.constant 0 : index
    %0 = vector.load %arg1[%c0, %c0_0] : memref<64x128xbf16, #tpu.memory_space<vmem>>, vector<64x128xbf16>
    %c0_1 = arith.constant 0 : index
    %c0_2 = arith.constant 0 : index
    %1 = vector.load %arg2[%c0_1, %c0_2] : memref<16x128xf32, #tpu.memory_space<vmem>>, vector<16x128xf32>
    %c0_3 = arith.constant 0 : index
    %c0_4 = arith.constant 0 : index
    %2 = vector.load %arg3[%c0_3, %c0_4] : memref<16x128xf32, #tpu.memory_space<vmem>>, vector<16x128xf32>
    %c0_5 = arith.constant 0 : index
    %c0_6 = arith.constant 0 : index
    %3 = vector.load %arg4[%c0_5, %c0_6] : memref<1x128xf32, #tpu.memory_space<vmem>>, vector<1x128xf32>
    %c0_7 = arith.constant 0 : index
    %c0_8 = arith.constant 0 : index
    %4 = vector.load %arg5[%c0_7, %c0_8] : memref<1x128xf32, #tpu.memory_space<vmem>>, vector<1x128xf32>
    %cst = arith.constant dense<0.000000e+00> : vector<128xf32>
    %5 = vector.multi_reduction <add>, %1, %cst [0] : vector<16x128xf32> to vector<128xf32>
    %6 = vector.shape_cast %5 : vector<128xf32> to vector<1x128xf32>
    %cst_9 = arith.constant dense<0.000000e+00> : vector<128xf32>
    %7 = vector.multi_reduction <add>, %2, %cst_9 [0] : vector<16x128xf32> to vector<128xf32>
    %8 = vector.shape_cast %7 : vector<128xf32> to vector<1x128xf32>
    %cst_10 = arith.constant 7.812500e-03 : f32
    %9 = vector.broadcast %cst_10 : f32 to vector<1x128xf32>
    %10 = arith.mulf %6, %9 : vector<1x128xf32>
    %cst_11 = arith.constant 7.812500e-03 : f32
    %11 = vector.broadcast %cst_11 : f32 to vector<1x128xf32>
    %12 = arith.mulf %8, %11 : vector<1x128xf32>
    %13 = arith.mulf %10, %10 : vector<1x128xf32>
    %14 = arith.subf %12, %13 : vector<1x128xf32>
    %cst_12 = arith.constant 0.000000e+00 : f32
    %15 = vector.broadcast %cst_12 : f32 to vector<1x128xf32>
    %16 = arith.maximumf %14, %15 : vector<1x128xf32>
    %cst_13 = arith.constant 9.99999974E-6 : f32
    %17 = vector.broadcast %cst_13 : f32 to vector<1x128xf32>
    %18 = arith.addf %16, %17 : vector<1x128xf32>
    %19 = math.rsqrt %18 : vector<1x128xf32>
    %20 = arith.mulf %3, %19 : vector<1x128xf32>
    %21 = arith.mulf %10, %20 : vector<1x128xf32>
    %22 = arith.subf %4, %21 : vector<1x128xf32>
    %23 = arith.extf %0 : vector<64x128xbf16> to vector<64x128xf32>
    %24 = vector.broadcast %20 : vector<1x128xf32> to vector<64x128xf32>
    %25 = arith.mulf %23, %24 : vector<64x128xf32>
    %26 = vector.broadcast %22 : vector<1x128xf32> to vector<64x128xf32>
    %27 = arith.addf %25, %26 : vector<64x128xf32>
    %cst_14 = arith.constant 0.000000e+00 : f32
    %28 = vector.broadcast %cst_14 : f32 to vector<64x128xf32>
    %29 = arith.maximumf %27, %28 : vector<64x128xf32>
    %30 = arith.truncf %29 : vector<64x128xf32> to vector<64x128xbf16>
    %c0_15 = arith.constant 0 : index
    %c0_16 = arith.constant 0 : index
    %31 = vector.load %arg6[%c0_15, %c0_16] : memref<64x128xbf16, #tpu.memory_space<vmem>>, vector<64x128xbf16>
    tpu.vector_store %arg6[%c0_15, %c0_16], %30 {strides = array<i32>} : memref<64x128xbf16, #tpu.memory_space<vmem>>, vector<64x128xbf16>,
    return
  }
  func.func @transform_0(%arg0: i32) -> (i32, i32) {
    %c0_i32 = arith.constant 0 : i32
    %c0_i32_0 = arith.constant 0 : i32
    return %arg0, %c0_i32 : i32, i32
  }
  func.func @transform_1(%arg0: i32) -> (i32, i32) {
    %c0_i32 = arith.constant 0 : i32
    %c0_i32_0 = arith.constant 0 : i32
    %c0_i32_1 = arith.constant 0 : i32
    return %c0_i32, %c0_i32_0 : i32, i32
  }
  func.func @transform_2(%arg0: i32) -> (i32, i32) {
    %c0_i32 = arith.constant 0 : i32
    %c0_i32_0 = arith.constant 0 : i32
    %c0_i32_1 = arith.constant 0 : i32
    return %c0_i32, %c0_i32_0 : i32, i32
  }
  func.func @transform_3(%arg0: i32) -> (i32, i32) {
    %c0_i32 = arith.constant 0 : i32
    %c0_i32_0 = arith.constant 0 : i32
    %c0_i32_1 = arith.constant 0 : i32
    return %c0_i32, %c0_i32_0 : i32, i32
  }
  func.func @transform_4(%arg0: i32) -> (i32, i32) {
    %c0_i32 = arith.constant 0 : i32
    %c0_i32_0 = arith.constant 0 : i32
    %c0_i32_1 = arith.constant 0 : i32
    return %c0_i32, %c0_i32_0 : i32, i32
  }
  func.func @transform_5(%arg0: i32) -> (i32, i32) {
    %c0_i32 = arith.constant 0 : i32
    %c0_i32_0 = arith.constant 0 : i32
    return %arg0, %c0_i32 : i32, i32
  }
}

module attributes {stable_mosaic.version = 11 : i64} {
  func.func @kernel(%arg0: i32, %arg1: i32, %arg2: memref<64x36xbf16, #tpu.memory_space<vmem>>, %arg3: memref<36x128xbf16, #tpu.memory_space<vmem>>, %arg4: memref<64x128xbf16, #tpu.memory_space<vmem>>, %arg5: memref<8x128xf32, #tpu.memory_space<vmem>>, %arg6: memref<8x128xf32, #tpu.memory_space<vmem>>) attributes {dimension_semantics = [#tpu.dimension_semantics<parallel>, #tpu.dimension_semantics<arbitrary>], iteration_bounds = array<i64: 2, 1>, scalar_prefetch = 0 : i64, scratch_operands = 0 : i64, tpu.core_type = #tpu.core_type<tc>, window_params = [{transform_indices = @transform_0, window_bounds = array<i64: 64, 36>}, {pipeline_mode = #tpu.pipeline_mode<synchronous>, transform_indices = @transform_1, window_bounds = array<i64: 36, 128>}, {transform_indices = @transform_2, window_bounds = array<i64: 64, 128>}, {transform_indices = @transform_3, window_bounds = array<i64: 8, 128>}, {transform_indices = @transform_4, window_bounds = array<i64: 8, 128>}]} {
    %c0_i32 = arith.constant 0 : i32
    %0 = arith.cmpi eq, %arg1, %c0_i32 : i32
    %1 = arith.extui %0 : i1 to i32
    %c0_i32_0 = arith.constant 0 : i32
    %2 = arith.cmpi ne, %1, %c0_i32_0 : i32
    scf.if %2 {
      %cst_16 = arith.constant 0.000000e+00 : f32
      %18 = vector.broadcast %cst_16 : f32 to vector<8x128xf32>
      %c0_17 = arith.constant 0 : index
      %c0_18 = arith.constant 0 : index
      %19 = vector.load %arg5[%c0_17, %c0_18] : memref<8x128xf32, #tpu.memory_space<vmem>>, vector<8x128xf32>
      tpu.vector_store %arg5[%c0_17, %c0_18], %18 {strides = array<i32>} : memref<8x128xf32, #tpu.memory_space<vmem>>, vector<8x128xf32>,
      %cst_19 = arith.constant 0.000000e+00 : f32
      %20 = vector.broadcast %cst_19 : f32 to vector<8x128xf32>
      %c0_20 = arith.constant 0 : index
      %c0_21 = arith.constant 0 : index
      %21 = vector.load %arg6[%c0_20, %c0_21] : memref<8x128xf32, #tpu.memory_space<vmem>>, vector<8x128xf32>
      tpu.vector_store %arg6[%c0_20, %c0_21], %20 {strides = array<i32>} : memref<8x128xf32, #tpu.memory_space<vmem>>, vector<8x128xf32>,
    } else {
    }
    %c0 = arith.constant 0 : index
    %c0_1 = arith.constant 0 : index
    %3 = vector.load %arg2[%c0, %c0_1] : memref<64x36xbf16, #tpu.memory_space<vmem>>, vector<64x36xbf16>
    %c0_2 = arith.constant 0 : index
    %c0_3 = arith.constant 0 : index
    %4 = vector.load %arg3[%c0_2, %c0_3] : memref<36x128xbf16, #tpu.memory_space<vmem>>, vector<36x128xbf16>
    %cst = arith.constant dense<0.000000e+00> : vector<64x128xf32>
    %5 = tpu.matmul %3, %4, %cst {dimension_numbers = #tpu.dot_dimension_numbers<[1], [0], [0], [1], [0, 0, 1, 1], [], []>} : vector<64x36xbf16>, vector<36x128xbf16>, vector<64x128xf32> -> vector<64x128xf32>
    %6 = arith.truncf %5 : vector<64x128xf32> to vector<64x128xbf16>
    %c0_4 = arith.constant 0 : index
    %c0_5 = arith.constant 0 : index
    %7 = vector.load %arg4[%c0_4, %c0_5] : memref<64x128xbf16, #tpu.memory_space<vmem>>, vector<64x128xbf16>
    tpu.vector_store %arg4[%c0_4, %c0_5], %6 {strides = array<i32>} : memref<64x128xbf16, #tpu.memory_space<vmem>>, vector<64x128xbf16>,
    %8 = vector.shape_cast %5 : vector<64x128xf32> to vector<8x8x128xf32>
    %c0_6 = arith.constant 0 : index
    %c0_7 = arith.constant 0 : index
    %9 = vector.load %arg5[%c0_6, %c0_7] : memref<8x128xf32, #tpu.memory_space<vmem>>, vector<8x128xf32>
    %cst_8 = arith.constant dense<0.000000e+00> : vector<8x128xf32>
    %10 = vector.multi_reduction <add>, %8, %cst_8 [0] : vector<8x8x128xf32> to vector<8x128xf32>
    %11 = arith.addf %9, %10 : vector<8x128xf32>
    %c0_9 = arith.constant 0 : index
    %c0_10 = arith.constant 0 : index
    %12 = vector.load %arg5[%c0_9, %c0_10] : memref<8x128xf32, #tpu.memory_space<vmem>>, vector<8x128xf32>
    tpu.vector_store %arg5[%c0_9, %c0_10], %11 {strides = array<i32>} : memref<8x128xf32, #tpu.memory_space<vmem>>, vector<8x128xf32>,
    %c0_11 = arith.constant 0 : index
    %c0_12 = arith.constant 0 : index
    %13 = vector.load %arg6[%c0_11, %c0_12] : memref<8x128xf32, #tpu.memory_space<vmem>>, vector<8x128xf32>
    %14 = arith.mulf %8, %8 : vector<8x8x128xf32>
    %cst_13 = arith.constant dense<0.000000e+00> : vector<8x128xf32>
    %15 = vector.multi_reduction <add>, %14, %cst_13 [0] : vector<8x8x128xf32> to vector<8x128xf32>
    %16 = arith.addf %13, %15 : vector<8x128xf32>
    %c0_14 = arith.constant 0 : index
    %c0_15 = arith.constant 0 : index
    %17 = vector.load %arg6[%c0_14, %c0_15] : memref<8x128xf32, #tpu.memory_space<vmem>>, vector<8x128xf32>
    tpu.vector_store %arg6[%c0_14, %c0_15], %16 {strides = array<i32>} : memref<8x128xf32, #tpu.memory_space<vmem>>, vector<8x128xf32>,
    return
  }
  func.func @transform_0(%arg0: i32, %arg1: i32) -> (i32, i32) {
    %c1_i32 = arith.constant 1 : i32
    %0 = arith.muli %arg0, %c1_i32 : i32
    %1 = arith.addi %0, %arg1 : i32
    %c0_i32 = arith.constant 0 : i32
    %c0_i32_0 = arith.constant 0 : i32
    return %1, %c0_i32 : i32, i32
  }
  func.func @transform_1(%arg0: i32, %arg1: i32) -> (i32, i32) {
    %c0_i32 = arith.constant 0 : i32
    %c0_i32_0 = arith.constant 0 : i32
    %c0_i32_1 = arith.constant 0 : i32
    return %c0_i32, %c0_i32_0 : i32, i32
  }
  func.func @transform_2(%arg0: i32, %arg1: i32) -> (i32, i32) {
    %c1_i32 = arith.constant 1 : i32
    %0 = arith.muli %arg0, %c1_i32 : i32
    %1 = arith.addi %0, %arg1 : i32
    %c0_i32 = arith.constant 0 : i32
    %c0_i32_0 = arith.constant 0 : i32
    return %1, %c0_i32 : i32, i32
  }
  func.func @transform_3(%arg0: i32, %arg1: i32) -> (i32, i32) {
    %c0_i32 = arith.constant 0 : i32
    %c0_i32_0 = arith.constant 0 : i32
    return %arg0, %c0_i32 : i32, i32
  }
  func.func @transform_4(%arg0: i32, %arg1: i32) -> (i32, i32) {
    %c0_i32 = arith.constant 0 : i32
    %c0_i32_0 = arith.constant 0 : i32
    return %arg0, %c0_i32 : i32, i32
  }
}

module attributes {stable_mosaic.version = 11 : i64} {
  func.func @kernel(%arg0: i32, %arg1: memref<64x128xbf16, #tpu.memory_space<vmem>>, %arg2: memref<16x128xf32, #tpu.memory_space<vmem>>, %arg3: memref<16x128xf32, #tpu.memory_space<vmem>>, %arg4: memref<1x128xf32, #tpu.memory_space<vmem>>, %arg5: memref<1x128xf32, #tpu.memory_space<vmem>>, %arg6: memref<64x128xbf16, #tpu.memory_space<vmem>>, %arg7: memref<16x128xf32, #tpu.memory_space<vmem>>, %arg8: memref<16x128xf32, #tpu.memory_space<vmem>>, %arg9: memref<1x128xf32, #tpu.memory_space<vmem>>, %arg10: memref<1x128xf32, #tpu.memory_space<vmem>>, %arg11: memref<64x128xf32, #tpu.memory_space<vmem>>) attributes {dimension_semantics = [#tpu.dimension_semantics<parallel>], iteration_bounds = array<i64: 2>, scalar_prefetch = 0 : i64, scratch_operands = 0 : i64, tpu.core_type = #tpu.core_type<tc>, window_params = [{transform_indices = @transform_0, window_bounds = array<i64: 64, 128>}, {pipeline_mode = #tpu.pipeline_mode<synchronous>, transform_indices = @transform_1, window_bounds = array<i64: 16, 128>}, {pipeline_mode = #tpu.pipeline_mode<synchronous>, transform_indices = @transform_2, window_bounds = array<i64: 16, 128>}, {pipeline_mode = #tpu.pipeline_mode<synchronous>, transform_indices = @transform_3, window_bounds = array<i64: 1, 128>}, {pipeline_mode = #tpu.pipeline_mode<synchronous>, transform_indices = @transform_4, window_bounds = array<i64: 1, 128>}, {transform_indices = @transform_5, window_bounds = array<i64: 64, 128>}, {pipeline_mode = #tpu.pipeline_mode<synchronous>, transform_indices = @transform_6, window_bounds = array<i64: 16, 128>}, {pipeline_mode = #tpu.pipeline_mode<synchronous>, transform_indices = @transform_7, window_bounds = array<i64: 16, 128>}, {pipeline_mode = #tpu.pipeline_mode<synchronous>, transform_indices = @transform_8, window_bounds = array<i64: 1, 128>}, {pipeline_mode = #tpu.pipeline_mode<synchronous>, transform_indices = @transform_9, window_bounds = array<i64: 1, 128>}, {transform_indices = @transform_10, window_bounds = array<i64: 64, 128>}]} {
    %c0 = arith.constant 0 : index
    %c0_0 = arith.constant 0 : index
    %0 = vector.load %arg1[%c0, %c0_0] : memref<64x128xbf16, #tpu.memory_space<vmem>>, vector<64x128xbf16>
    %c0_1 = arith.constant 0 : index
    %c0_2 = arith.constant 0 : index
    %1 = vector.load %arg2[%c0_1, %c0_2] : memref<16x128xf32, #tpu.memory_space<vmem>>, vector<16x128xf32>
    %c0_3 = arith.constant 0 : index
    %c0_4 = arith.constant 0 : index
    %2 = vector.load %arg3[%c0_3, %c0_4] : memref<16x128xf32, #tpu.memory_space<vmem>>, vector<16x128xf32>
    %c0_5 = arith.constant 0 : index
    %c0_6 = arith.constant 0 : index
    %3 = vector.load %arg4[%c0_5, %c0_6] : memref<1x128xf32, #tpu.memory_space<vmem>>, vector<1x128xf32>
    %c0_7 = arith.constant 0 : index
    %c0_8 = arith.constant 0 : index
    %4 = vector.load %arg5[%c0_7, %c0_8] : memref<1x128xf32, #tpu.memory_space<vmem>>, vector<1x128xf32>
    %cst = arith.constant dense<0.000000e+00> : vector<128xf32>
    %5 = vector.multi_reduction <add>, %1, %cst [0] : vector<16x128xf32> to vector<128xf32>
    %6 = vector.shape_cast %5 : vector<128xf32> to vector<1x128xf32>
    %cst_9 = arith.constant dense<0.000000e+00> : vector<128xf32>
    %7 = vector.multi_reduction <add>, %2, %cst_9 [0] : vector<16x128xf32> to vector<128xf32>
    %8 = vector.shape_cast %7 : vector<128xf32> to vector<1x128xf32>
    %cst_10 = arith.constant 7.812500e-03 : f32
    %9 = vector.broadcast %cst_10 : f32 to vector<1x128xf32>
    %10 = arith.mulf %6, %9 : vector<1x128xf32>
    %cst_11 = arith.constant 7.812500e-03 : f32
    %11 = vector.broadcast %cst_11 : f32 to vector<1x128xf32>
    %12 = arith.mulf %8, %11 : vector<1x128xf32>
    %13 = arith.mulf %10, %10 : vector<1x128xf32>
    %14 = arith.subf %12, %13 : vector<1x128xf32>
    %cst_12 = arith.constant 0.000000e+00 : f32
    %15 = vector.broadcast %cst_12 : f32 to vector<1x128xf32>
    %16 = arith.maximumf %14, %15 : vector<1x128xf32>
    %cst_13 = arith.constant 9.99999974E-6 : f32
    %17 = vector.broadcast %cst_13 : f32 to vector<1x128xf32>
    %18 = arith.addf %16, %17 : vector<1x128xf32>
    %19 = math.rsqrt %18 : vector<1x128xf32>
    %20 = arith.mulf %3, %19 : vector<1x128xf32>
    %21 = arith.mulf %10, %20 : vector<1x128xf32>
    %22 = arith.subf %4, %21 : vector<1x128xf32>
    %23 = arith.extf %0 : vector<64x128xbf16> to vector<64x128xf32>
    %24 = vector.broadcast %20 : vector<1x128xf32> to vector<64x128xf32>
    %25 = arith.mulf %23, %24 : vector<64x128xf32>
    %26 = vector.broadcast %22 : vector<1x128xf32> to vector<64x128xf32>
    %27 = arith.addf %25, %26 : vector<64x128xf32>
    %c0_14 = arith.constant 0 : index
    %c0_15 = arith.constant 0 : index
    %28 = vector.load %arg6[%c0_14, %c0_15] : memref<64x128xbf16, #tpu.memory_space<vmem>>, vector<64x128xbf16>
    %c0_16 = arith.constant 0 : index
    %c0_17 = arith.constant 0 : index
    %29 = vector.load %arg7[%c0_16, %c0_17] : memref<16x128xf32, #tpu.memory_space<vmem>>, vector<16x128xf32>
    %c0_18 = arith.constant 0 : index
    %c0_19 = arith.constant 0 : index
    %30 = vector.load %arg8[%c0_18, %c0_19] : memref<16x128xf32, #tpu.memory_space<vmem>>, vector<16x128xf32>
    %c0_20 = arith.constant 0 : index
    %c0_21 = arith.constant 0 : index
    %31 = vector.load %arg9[%c0_20, %c0_21] : memref<1x128xf32, #tpu.memory_space<vmem>>, vector<1x128xf32>
    %c0_22 = arith.constant 0 : index
    %c0_23 = arith.constant 0 : index
    %32 = vector.load %arg10[%c0_22, %c0_23] : memref<1x128xf32, #tpu.memory_space<vmem>>, vector<1x128xf32>
    %cst_24 = arith.constant dense<0.000000e+00> : vector<128xf32>
    %33 = vector.multi_reduction <add>, %29, %cst_24 [0] : vector<16x128xf32> to vector<128xf32>
    %34 = vector.shape_cast %33 : vector<128xf32> to vector<1x128xf32>
    %cst_25 = arith.constant dense<0.000000e+00> : vector<128xf32>
    %35 = vector.multi_reduction <add>, %30, %cst_25 [0] : vector<16x128xf32> to vector<128xf32>
    %36 = vector.shape_cast %35 : vector<128xf32> to vector<1x128xf32>
    %cst_26 = arith.constant 7.812500e-03 : f32
    %37 = vector.broadcast %cst_26 : f32 to vector<1x128xf32>
    %38 = arith.mulf %34, %37 : vector<1x128xf32>
    %cst_27 = arith.constant 7.812500e-03 : f32
    %39 = vector.broadcast %cst_27 : f32 to vector<1x128xf32>
    %40 = arith.mulf %36, %39 : vector<1x128xf32>
    %41 = arith.mulf %38, %38 : vector<1x128xf32>
    %42 = arith.subf %40, %41 : vector<1x128xf32>
    %cst_28 = arith.constant 0.000000e+00 : f32
    %43 = vector.broadcast %cst_28 : f32 to vector<1x128xf32>
    %44 = arith.maximumf %42, %43 : vector<1x128xf32>
    %cst_29 = arith.constant 9.99999974E-6 : f32
    %45 = vector.broadcast %cst_29 : f32 to vector<1x128xf32>
    %46 = arith.addf %44, %45 : vector<1x128xf32>
    %47 = math.rsqrt %46 : vector<1x128xf32>
    %48 = arith.mulf %31, %47 : vector<1x128xf32>
    %49 = arith.mulf %38, %48 : vector<1x128xf32>
    %50 = arith.subf %32, %49 : vector<1x128xf32>
    %51 = arith.extf %28 : vector<64x128xbf16> to vector<64x128xf32>
    %52 = vector.broadcast %48 : vector<1x128xf32> to vector<64x128xf32>
    %53 = arith.mulf %51, %52 : vector<64x128xf32>
    %54 = vector.broadcast %50 : vector<1x128xf32> to vector<64x128xf32>
    %55 = arith.addf %53, %54 : vector<64x128xf32>
    %56 = arith.addf %27, %55 : vector<64x128xf32>
    %cst_30 = arith.constant 0.000000e+00 : f32
    %57 = vector.broadcast %cst_30 : f32 to vector<64x128xf32>
    %58 = arith.maximumf %56, %57 : vector<64x128xf32>
    %c0_31 = arith.constant 0 : index
    %c0_32 = arith.constant 0 : index
    %59 = vector.load %arg11[%c0_31, %c0_32] : memref<64x128xf32, #tpu.memory_space<vmem>>, vector<64x128xf32>
    tpu.vector_store %arg11[%c0_31, %c0_32], %58 {strides = array<i32>} : memref<64x128xf32, #tpu.memory_space<vmem>>, vector<64x128xf32>,
    return
  }
  func.func @transform_0(%arg0: i32) -> (i32, i32) {
    %c0_i32 = arith.constant 0 : i32
    %c0_i32_0 = arith.constant 0 : i32
    return %arg0, %c0_i32 : i32, i32
  }
  func.func @transform_1(%arg0: i32) -> (i32, i32) {
    %c0_i32 = arith.constant 0 : i32
    %c0_i32_0 = arith.constant 0 : i32
    %c0_i32_1 = arith.constant 0 : i32
    return %c0_i32, %c0_i32_0 : i32, i32
  }
  func.func @transform_2(%arg0: i32) -> (i32, i32) {
    %c0_i32 = arith.constant 0 : i32
    %c0_i32_0 = arith.constant 0 : i32
    %c0_i32_1 = arith.constant 0 : i32
    return %c0_i32, %c0_i32_0 : i32, i32
  }
  func.func @transform_3(%arg0: i32) -> (i32, i32) {
    %c0_i32 = arith.constant 0 : i32
    %c0_i32_0 = arith.constant 0 : i32
    %c0_i32_1 = arith.constant 0 : i32
    return %c0_i32, %c0_i32_0 : i32, i32
  }
  func.func @transform_4(%arg0: i32) -> (i32, i32) {
    %c0_i32 = arith.constant 0 : i32
    %c0_i32_0 = arith.constant 0 : i32
    %c0_i32_1 = arith.constant 0 : i32
    return %c0_i32, %c0_i32_0 : i32, i32
  }
  func.func @transform_5(%arg0: i32) -> (i32, i32) {
    %c0_i32 = arith.constant 0 : i32
    %c0_i32_0 = arith.constant 0 : i32
    return %arg0, %c0_i32 : i32, i32
  }
  func.func @transform_6(%arg0: i32) -> (i32, i32) {
    %c0_i32 = arith.constant 0 : i32
    %c0_i32_0 = arith.constant 0 : i32
    %c0_i32_1 = arith.constant 0 : i32
    return %c0_i32, %c0_i32_0 : i32, i32
  }
  func.func @transform_7(%arg0: i32) -> (i32, i32) {
    %c0_i32 = arith.constant 0 : i32
    %c0_i32_0 = arith.constant 0 : i32
    %c0_i32_1 = arith.constant 0 : i32
    return %c0_i32, %c0_i32_0 : i32, i32
  }
  func.func @transform_8(%arg0: i32) -> (i32, i32) {
    %c0_i32 = arith.constant 0 : i32
    %c0_i32_0 = arith.constant 0 : i32
    %c0_i32_1 = arith.constant 0 : i32
    return %c0_i32, %c0_i32_0 : i32, i32
  }
  func.func @transform_9(%arg0: i32) -> (i32, i32) {
    %c0_i32 = arith.constant 0 : i32
    %c0_i32_0 = arith.constant 0 : i32
    %c0_i32_1 = arith.constant 0 : i32
    return %c0_i32, %c0_i32_0 : i32, i32
  }
  func.func @transform_10(%arg0: i32) -> (i32, i32) {
    %c0_i32 = arith.constant 0 : i32
    %c0_i32_0 = arith.constant 0 : i32
    return %arg0, %c0_i32 : i32, i32
  }
}

module attributes {stable_mosaic.version = 11 : i64} {
  func.func @kernel(%arg0: i32, %arg1: i32, %arg2: memref<64x72xbf16, #tpu.memory_space<vmem>>, %arg3: memref<72x128xbf16, #tpu.memory_space<vmem>>, %arg4: memref<64x4xbf16, #tpu.memory_space<vmem>>, %arg5: memref<4x128xbf16, #tpu.memory_space<vmem>>, %arg6: memref<64x128xbf16, #tpu.memory_space<vmem>>, %arg7: memref<8x128xf32, #tpu.memory_space<vmem>>, %arg8: memref<8x128xf32, #tpu.memory_space<vmem>>, %arg9: memref<64x128xbf16, #tpu.memory_space<vmem>>, %arg10: memref<8x128xf32, #tpu.memory_space<vmem>>, %arg11: memref<8x128xf32, #tpu.memory_space<vmem>>) attributes {dimension_semantics = [#tpu.dimension_semantics<parallel>, #tpu.dimension_semantics<arbitrary>], iteration_bounds = array<i64: 2, 1>, scalar_prefetch = 0 : i64, scratch_operands = 0 : i64, tpu.core_type = #tpu.core_type<tc>, window_params = [{transform_indices = @transform_0, window_bounds = array<i64: 64, 72>}, {pipeline_mode = #tpu.pipeline_mode<synchronous>, transform_indices = @transform_1, window_bounds = array<i64: 72, 128>}, {transform_indices = @transform_2, window_bounds = array<i64: 64, 4>}, {pipeline_mode = #tpu.pipeline_mode<synchronous>, transform_indices = @transform_3, window_bounds = array<i64: 4, 128>}, {transform_indices = @transform_4, window_bounds = array<i64: 64, 128>}, {transform_indices = @transform_5, window_bounds = array<i64: 8, 128>}, {transform_indices = @transform_6, window_bounds = array<i64: 8, 128>}, {transform_indices = @transform_7, window_bounds = array<i64: 64, 128>}, {transform_indices = @transform_8, window_bounds = array<i64: 8, 128>}, {transform_indices = @transform_9, window_bounds = array<i64: 8, 128>}]} {
    %c0_i32 = arith.constant 0 : i32
    %0 = arith.cmpi eq, %arg1, %c0_i32 : i32
    %1 = arith.extui %0 : i1 to i32
    %c0_i32_0 = arith.constant 0 : i32
    %2 = arith.cmpi ne, %1, %c0_i32_0 : i32
    scf.if %2 {
      %cst_33 = arith.constant 0.000000e+00 : f32
      %33 = vector.broadcast %cst_33 : f32 to vector<8x128xf32>
      %c0_34 = arith.constant 0 : index
      %c0_35 = arith.constant 0 : index
      %34 = vector.load %arg7[%c0_34, %c0_35] : memref<8x128xf32, #tpu.memory_space<vmem>>, vector<8x128xf32>
      tpu.vector_store %arg7[%c0_34, %c0_35], %33 {strides = array<i32>} : memref<8x128xf32, #tpu.memory_space<vmem>>, vector<8x128xf32>,
      %cst_36 = arith.constant 0.000000e+00 : f32
      %35 = vector.broadcast %cst_36 : f32 to vector<8x128xf32>
      %c0_37 = arith.constant 0 : index
      %c0_38 = arith.constant 0 : index
      %36 = vector.load %arg8[%c0_37, %c0_38] : memref<8x128xf32, #tpu.memory_space<vmem>>, vector<8x128xf32>
      tpu.vector_store %arg8[%c0_37, %c0_38], %35 {strides = array<i32>} : memref<8x128xf32, #tpu.memory_space<vmem>>, vector<8x128xf32>,
      %cst_39 = arith.constant 0.000000e+00 : f32
      %37 = vector.broadcast %cst_39 : f32 to vector<8x128xf32>
      %c0_40 = arith.constant 0 : index
      %c0_41 = arith.constant 0 : index
      %38 = vector.load %arg10[%c0_40, %c0_41] : memref<8x128xf32, #tpu.memory_space<vmem>>, vector<8x128xf32>
      tpu.vector_store %arg10[%c0_40, %c0_41], %37 {strides = array<i32>} : memref<8x128xf32, #tpu.memory_space<vmem>>, vector<8x128xf32>,
      %cst_42 = arith.constant 0.000000e+00 : f32
      %39 = vector.broadcast %cst_42 : f32 to vector<8x128xf32>
      %c0_43 = arith.constant 0 : index
      %c0_44 = arith.constant 0 : index
      %40 = vector.load %arg11[%c0_43, %c0_44] : memref<8x128xf32, #tpu.memory_space<vmem>>, vector<8x128xf32>
      tpu.vector_store %arg11[%c0_43, %c0_44], %39 {strides = array<i32>} : memref<8x128xf32, #tpu.memory_space<vmem>>, vector<8x128xf32>,
    } else {
    }
    %c0 = arith.constant 0 : index
    %c0_1 = arith.constant 0 : index
    %3 = vector.load %arg2[%c0, %c0_1] : memref<64x72xbf16, #tpu.memory_space<vmem>>, vector<64x72xbf16>
    %c0_2 = arith.constant 0 : index
    %c0_3 = arith.constant 0 : index
    %4 = vector.load %arg3[%c0_2, %c0_3] : memref<72x128xbf16, #tpu.memory_space<vmem>>, vector<72x128xbf16>
    %cst = arith.constant dense<0.000000e+00> : vector<64x128xf32>
    %5 = tpu.matmul %3, %4, %cst {dimension_numbers = #tpu.dot_dimension_numbers<[1], [0], [0], [1], [0, 0, 1, 1], [], []>} : vector<64x72xbf16>, vector<72x128xbf16>, vector<64x128xf32> -> vector<64x128xf32>
    %6 = arith.truncf %5 : vector<64x128xf32> to vector<64x128xbf16>
    %c0_4 = arith.constant 0 : index
    %c0_5 = arith.constant 0 : index
    %7 = vector.load %arg6[%c0_4, %c0_5] : memref<64x128xbf16, #tpu.memory_space<vmem>>, vector<64x128xbf16>
    tpu.vector_store %arg6[%c0_4, %c0_5], %6 {strides = array<i32>} : memref<64x128xbf16, #tpu.memory_space<vmem>>, vector<64x128xbf16>,
    %8 = vector.shape_cast %5 : vector<64x128xf32> to vector<8x8x128xf32>
    %c0_6 = arith.constant 0 : index
    %c0_7 = arith.constant 0 : index
    %9 = vector.load %arg7[%c0_6, %c0_7] : memref<8x128xf32, #tpu.memory_space<vmem>>, vector<8x128xf32>
    %cst_8 = arith.constant dense<0.000000e+00> : vector<8x128xf32>
    %10 = vector.multi_reduction <add>, %8, %cst_8 [0] : vector<8x8x128xf32> to vector<8x128xf32>
    %11 = arith.addf %9, %10 : vector<8x128xf32>
    %c0_9 = arith.constant 0 : index
    %c0_10 = arith.constant 0 : index
    %12 = vector.load %arg7[%c0_9, %c0_10] : memref<8x128xf32, #tpu.memory_space<vmem>>, vector<8x128xf32>
    tpu.vector_store %arg7[%c0_9, %c0_10], %11 {strides = array<i32>} : memref<8x128xf32, #tpu.memory_space<vmem>>, vector<8x128xf32>,
    %c0_11 = arith.constant 0 : index
    %c0_12 = arith.constant 0 : index
    %13 = vector.load %arg8[%c0_11, %c0_12] : memref<8x128xf32, #tpu.memory_space<vmem>>, vector<8x128xf32>
    %14 = arith.mulf %8, %8 : vector<8x8x128xf32>
    %cst_13 = arith.constant dense<0.000000e+00> : vector<8x128xf32>
    %15 = vector.multi_reduction <add>, %14, %cst_13 [0] : vector<8x8x128xf32> to vector<8x128xf32>
    %16 = arith.addf %13, %15 : vector<8x128xf32>
    %c0_14 = arith.constant 0 : index
    %c0_15 = arith.constant 0 : index
    %17 = vector.load %arg8[%c0_14, %c0_15] : memref<8x128xf32, #tpu.memory_space<vmem>>, vector<8x128xf32>
    tpu.vector_store %arg8[%c0_14, %c0_15], %16 {strides = array<i32>} : memref<8x128xf32, #tpu.memory_space<vmem>>, vector<8x128xf32>,
    %c0_16 = arith.constant 0 : index
    %c0_17 = arith.constant 0 : index
    %18 = vector.load %arg4[%c0_16, %c0_17] : memref<64x4xbf16, #tpu.memory_space<vmem>>, vector<64x4xbf16>
    %c0_18 = arith.constant 0 : index
    %c0_19 = arith.constant 0 : index
    %19 = vector.load %arg5[%c0_18, %c0_19] : memref<4x128xbf16, #tpu.memory_space<vmem>>, vector<4x128xbf16>
    %cst_20 = arith.constant dense<0.000000e+00> : vector<64x128xf32>
    %20 = tpu.matmul %18, %19, %cst_20 {dimension_numbers = #tpu.dot_dimension_numbers<[1], [0], [0], [1], [0, 0, 1, 1], [], []>} : vector<64x4xbf16>, vector<4x128xbf16>, vector<64x128xf32> -> vector<64x128xf32>
    %21 = arith.truncf %20 : vector<64x128xf32> to vector<64x128xbf16>
    %c0_21 = arith.constant 0 : index
    %c0_22 = arith.constant 0 : index
    %22 = vector.load %arg9[%c0_21, %c0_22] : memref<64x128xbf16, #tpu.memory_space<vmem>>, vector<64x128xbf16>
    tpu.vector_store %arg9[%c0_21, %c0_22], %21 {strides = array<i32>} : memref<64x128xbf16, #tpu.memory_space<vmem>>, vector<64x128xbf16>,
    %23 = vector.shape_cast %20 : vector<64x128xf32> to vector<8x8x128xf32>
    %c0_23 = arith.constant 0 : index
    %c0_24 = arith.constant 0 : index
    %24 = vector.load %arg10[%c0_23, %c0_24] : memref<8x128xf32, #tpu.memory_space<vmem>>, vector<8x128xf32>
    %cst_25 = arith.constant dense<0.000000e+00> : vector<8x128xf32>
    %25 = vector.multi_reduction <add>, %23, %cst_25 [0] : vector<8x8x128xf32> to vector<8x128xf32>
    %26 = arith.addf %24, %25 : vector<8x128xf32>
    %c0_26 = arith.constant 0 : index
    %c0_27 = arith.constant 0 : index
    %27 = vector.load %arg10[%c0_26, %c0_27] : memref<8x128xf32, #tpu.memory_space<vmem>>, vector<8x128xf32>
    tpu.vector_store %arg10[%c0_26, %c0_27], %26 {strides = array<i32>} : memref<8x128xf32, #tpu.memory_space<vmem>>, vector<8x128xf32>,
    %c0_28 = arith.constant 0 : index
    %c0_29 = arith.constant 0 : index
    %28 = vector.load %arg11[%c0_28, %c0_29] : memref<8x128xf32, #tpu.memory_space<vmem>>, vector<8x128xf32>
    %29 = arith.mulf %23, %23 : vector<8x8x128xf32>
    %cst_30 = arith.constant dense<0.000000e+00> : vector<8x128xf32>
    %30 = vector.multi_reduction <add>, %29, %cst_30 [0] : vector<8x8x128xf32> to vector<8x128xf32>
    %31 = arith.addf %28, %30 : vector<8x128xf32>
    %c0_31 = arith.constant 0 : index
    %c0_32 = arith.constant 0 : index
    %32 = vector.load %arg11[%c0_31, %c0_32] : memref<8x128xf32, #tpu.memory_space<vmem>>, vector<8x128xf32>
    tpu.vector_store %arg11[%c0_31, %c0_32], %31 {strides = array<i32>} : memref<8x128xf32, #tpu.memory_space<vmem>>, vector<8x128xf32>,
    return
  }
  func.func @transform_0(%arg0: i32, %arg1: i32) -> (i32, i32) {
    %c1_i32 = arith.constant 1 : i32
    %0 = arith.muli %arg0, %c1_i32 : i32
    %1 = arith.addi %0, %arg1 : i32
    %c0_i32 = arith.constant 0 : i32
    %c0_i32_0 = arith.constant 0 : i32
    return %1, %c0_i32 : i32, i32
  }
  func.func @transform_1(%arg0: i32, %arg1: i32) -> (i32, i32) {
    %c0_i32 = arith.constant 0 : i32
    %c0_i32_0 = arith.constant 0 : i32
    %c0_i32_1 = arith.constant 0 : i32
    return %c0_i32, %c0_i32_0 : i32, i32
  }
  func.func @transform_2(%arg0: i32, %arg1: i32) -> (i32, i32) {
    %c1_i32 = arith.constant 1 : i32
    %0 = arith.muli %arg0, %c1_i32 : i32
    %1 = arith.addi %0, %arg1 : i32
    %c0_i32 = arith.constant 0 : i32
    %c0_i32_0 = arith.constant 0 : i32
    return %1, %c0_i32 : i32, i32
  }
  func.func @transform_3(%arg0: i32, %arg1: i32) -> (i32, i32) {
    %c0_i32 = arith.constant 0 : i32
    %c0_i32_0 = arith.constant 0 : i32
    %c0_i32_1 = arith.constant 0 : i32
    return %c0_i32, %c0_i32_0 : i32, i32
  }
  func.func @transform_4(%arg0: i32, %arg1: i32) -> (i32, i32) {
    %c1_i32 = arith.constant 1 : i32
    %0 = arith.muli %arg0, %c1_i32 : i32
    %1 = arith.addi %0, %arg1 : i32
    %c0_i32 = arith.constant 0 : i32
    %c0_i32_0 = arith.constant 0 : i32
    return %1, %c0_i32 : i32, i32
  }
  func.func @transform_5(%arg0: i32, %arg1: i32) -> (i32, i32) {
    %c0_i32 = arith.constant 0 : i32
    %c0_i32_0 = arith.constant 0 : i32
    return %arg0, %c0_i32 : i32, i32
  }
  func.func @transform_6(%arg0: i32, %arg1: i32) -> (i32, i32) {
    %c0_i32 = arith.constant 0 : i32
    %c0_i32_0 = arith.constant 0 : i32
    return %arg0, %c0_i32 : i32, i32
  }
  func.func @transform_7(%arg0: i32, %arg1: i32) -> (i32, i32) {
    %c1_i32 = arith.constant 1 : i32
    %0 = arith.muli %arg0, %c1_i32 : i32
    %1 = arith.addi %0, %arg1 : i32
    %c0_i32 = arith.constant 0 : i32
    %c0_i32_0 = arith.constant 0 : i32
    return %1, %c0_i32 : i32, i32
  }
  func.func @transform_8(%arg0: i32, %arg1: i32) -> (i32, i32) {
    %c0_i32 = arith.constant 0 : i32
    %c0_i32_0 = arith.constant 0 : i32
    return %arg0, %c0_i32 : i32, i32
  }
  func.func @transform_9(%arg0: i32, %arg1: i32) -> (i32, i32) {
    %c0_i32 = arith.constant 0 : i32
    %c0_i32_0 = arith.constant 0 : i32
    return %arg0, %c0_i32 : i32, i32
  }
}

</mosaic_0001>

<bundles_post_ra>
// kernel: residual_block_forward.5
= control target key start
LH: loop header
LB: loop body
LE: loop exit
PB: predicated region body
PF: predicated region fallthrough
CT: control target
= control target key end

     0   :  { %s523_s18 = smov 0   ;;  %s565_s0 = inlined_call_operand.vmem [shape: bf16[128,128], index: 0, kind: input, shape index: {}]   ;;  %s566_s1 = inlined_call_operand.vmem [shape: f32[16,128], index: 1, kind: input, shape index: {}]   ;;  %s567_s2 = inlined_call_operand.vmem [shape: f32[16,128], index: 2, kind: input, shape index: {}]   ;;  %s568_s3 = inlined_call_operand.vmem [shape: f32[1,128], index: 3, kind: input, shape index: {}]   ;;  %s569_s4 = inlined_call_operand.vmem [shape: f32[1,128], index: 4, kind: input, shape index: {}]   ;;  %s570_s5 = inlined_call_operand.vmem [shape: bf16[128,128], index: 5, kind: output, shape index: {}]  }
   0x1 LB: > { %s406_s19 = sadd.s32 4294967295, %s491_s18   ;;  %p410_p0 = scmp.ge.s32.totalorder %s491_s18, 1  ;;  %s491_s18 = sphi %s523_s18, %s15_s18  }
   0x2   : > { %p188_p1 = scmp.lt.s32.totalorder %s491_s18, 3 }
   0x4   : > { %p189_p2 = pnand %p410_p0, %p188_p1 }
   0x5   : > { %v236_v0 = vld [vmem:[%s566_s1] sm:$0xff] (!%p189_p2)  ;;  %v237_v1 = vld [vmem:[%s566_s1 + $0x8] sm:$0xff] (!%p189_p2)  ;;  %s411_s28 = sshll.u32 (!%p189_p2), %s406_s19, 3  ;;  %v275_v24 = vlaneseq (!%p189_p2) }
   0x6   : > { %192 = sbr.rel (%p189_p2) target bundleno = 57 (0x39), region = 40  ;;  %v238_v2 = vld [vmem:[%s567_s2] sm:$0xff] (!%p189_p2)  ;;  %v239_v3 = vld [vmem:[%s567_s2 + $0x8] sm:$0xff] (!%p189_p2)  ;;  %v242_v4 = vadd.f32 (!%p189_p2), %v237_v1, %v236_v0  ;;  %p217_p3 = scmp.lt.s32.totalorder (!%p189_p2), %s411_s28, 15 }
   0x7   : > { %v249_v5 = vadd.f32 (!%p189_p2), %v239_v3, %v238_v2  ;;  %v276_v25 = vshrl.u32 (!%p189_p2), %v275_v24, 7  ;;  %v240_v27 = vld [vmem:[%s568_s3] sm:$0x1] (!%p189_p2) }
   0x8   : > { %v243_v6 = vrot.slane (!%p189_p2), %v242_v4, 4  ;;  %v241_v37 = vld [vmem:[%s569_s4] sm:$0x1] (!%p189_p2) }
   0x9   : > { %v250_v7 = vrot.slane (!%p189_p2), %v249_v5, 4  ;;  %v277_v29 = vsub.s32 (!%p189_p2), 0, %v276_v25 }
   0xa   : > { %v244_v8 = vadd.f32 (!%p189_p2), %v243_v6, %v242_v4 }
   0xb   : > { %v251_v9 = vadd.f32 (!%p189_p2), %v250_v7, %v249_v5 }
   0xc   : > { %v245_v10 = vrot.slane (!%p189_p2), %v244_v8, 2 }
   0xd   : > { %v252_v11 = vrot.slane %v251_v9, 2  ;;  %s572_s28 = smov (!%p217_p3, %s411_s28), 15 }
   0xe   : > { %v246_v12 = vadd.f32 %v245_v10, %v244_v8  ;;  %s412_s29 = sshll.u32 %s572_s28, 2 }
   0xf   : > { %v253_v13 = vadd.f32 %v252_v11, %v251_v9  ;;  %s220_s7 = scalar_lea.vmem %s565_s0, %s412_s29  ;;  %s226_s14 = scalar_lea.vmem %s570_s5, %s412_s29 }
  0x10   : > { %v247_v14 = vrot.slane %v246_v12, 1  ;;  %v434_v26 = vld [vmem:[%s220_s7] sm:$0xff]   ;;  %v469_v28 = vld [vmem:[%s220_s7 + $0x8] sm:$0xff]   ;;  %v470_v30 = vld [vmem:[%s220_s7 + $0x10] sm:$0xff]  }
  0x11   : > { %v254_v15 = vrot.slane %v253_v13, 1  ;;  %v471_v31 = vld [vmem:[%s220_s7 + $0x18] sm:$0xff]   ;;  %v435_v33 = vunpack.c.l.bf16 %v434_v26  ;;  %v436_v34 = vunpack.c.h.bf16 %v434_v26  ;;  %v439_v36 = vunpack.c.l.bf16 %v469_v28 }
  0x12   : > { %v248_v16 = vadd.f32 %v247_v14, %v246_v12  ;;  %v440_v38 = vunpack.c.h.bf16 %v469_v28  ;;  %v443_v39 = vunpack.c.l.bf16 %v470_v30  ;;  %v444_v40 = vunpack.c.h.bf16 %v470_v30 }
  0x13   : > { %v255_v17 = vadd.f32 %v254_v15, %v253_v13  ;;  %v447_v41 = vunpack.c.l.bf16 %v471_v31  ;;  %v448_v44 = vunpack.c.h.bf16 %v471_v31 }
  0x14   : > { %v256_v18 = vmul.f32 0.0078125, %v248_v16 }
  0x15   : > { %v257_v19 = vmul.f32 0.0078125, %v255_v17 }
  0x16   : > { %v258_v20 = vmul.f32 %v256_v18, %v256_v18 }
  0x18   : > { %v259_v21 = vsub.f32 %v257_v19, %v258_v20 }
  0x1a   : > { %v260_v22 = vmax.f32 %v259_v21, 0.0 }
  0x1c   : > { %v261_v23 = vadd.f32 1e-05, %v260_v22 }
  0x1e   : > { %483 = vrsqrt.f32 %v261_v23 }
  0x28   : > { %v484_v32 = vpop.eup %483 }
  0x29   : > { %v263_v35 = vmul.f32 %v484_v32, %v240_v27 }
  0x2b   : > { %v264_v42 = vmul.f32 %v263_v35, %v256_v18  ;;  %v278_v43 = vrot.slane %v263_v35, %v277_v29 }
  0x2d   : > { %v265_v45 = vsub.f32 %v241_v37, %v264_v42  ;;  %v280_v46 = vmul.f32 %v435_v33, %v278_v43  ;;  %v281_v47 = vmul.f32 %v436_v34, %v278_v43  ;;  %v282_v48 = vmul.f32 %v439_v36, %v278_v43 }
  0x2e   : > { %v283_v49 = vmul.f32 %v440_v38, %v278_v43  ;;  %v284_v50 = vmul.f32 %v443_v39, %v278_v43  ;;  %v285_v51 = vmul.f32 %v444_v40, %v278_v43  ;;  %v286_v52 = vmul.f32 %v447_v41, %v278_v43 }
  0x2f   : > { %v292_v53 = vrot.slane %v265_v45, %v277_v29  ;;  %v287_v54 = vmul.f32 %v448_v44, %v278_v43 }
  0x31   : > { %v294_v55 = vadd.f32 %v292_v53, %v280_v46  ;;  %v295_v56 = vadd.f32 %v292_v53, %v281_v47  ;;  %v296_v57 = vadd.f32 %v292_v53, %v282_v48  ;;  %v297_v58 = vadd.f32 %v292_v53, %v283_v49 }
  0x32   : > { %v298_v59 = vadd.f32 %v292_v53, %v284_v50  ;;  %v299_v60 = vadd.f32 %v292_v53, %v285_v51  ;;  %v300_v61 = vadd.f32 %v292_v53, %v286_v52  ;;  %v301_v62 = vadd.f32 %v292_v53, %v287_v54 }
  0x33   : > { %v302_v63 = vmax.f32 %v294_v55, 0.0  ;;  %v303_v0 = vmax.f32 %v295_v56, 0.0  ;;  %v304_v1 = vmax.f32 %v296_v57, 0.0  ;;  %v305_v2 = vmax.f32 %v297_v58, 0.0 }
  0x34   : > { %v306_v3 = vmax.f32 %v298_v59, 0.0  ;;  %v307_v4 = vmax.f32 %v299_v60, 0.0  ;;  %v308_v5 = vmax.f32 %v300_v61, 0.0  ;;  %v309_v6 = vmax.f32 %v301_v62, 0.0 }
  0x35   : > { %v452_v7 = vpack.c.bf16 %v303_v0, %v302_v63  ;;  %v457_v8 = vpack.c.bf16 %v305_v2, %v304_v1 }
  0x36   : > { %v462_v9 = vpack.c.bf16 %v307_v4, %v306_v3  ;;  %v467_v10 = vpack.c.bf16 %v309_v6, %v308_v5 }
  0x37   : > { %453 = vst [vmem:[%s226_s14] sm:$0xff] %v452_v7   ;;  %472 = vst [vmem:[%s226_s14 + $0x8] sm:$0xff] %v457_v8  }
  0x38   : > { %473 = vst [vmem:[%s226_s14 + $0x10] sm:$0xff] %v462_v9   ;;  %474 = vst [vmem:[%s226_s14 + $0x18] sm:$0xff] %v467_v10  }
  0x39 PF: > { %s15_s18 = sadd.s32 1, %s491_s18  }
  0x3a   : > { %p12_p4 = scmp.ge.s32.totalorder %s15_s18, 4  }
  0x3c   :  { %14 = sbr.rel (!%p12_p4) target bundleno = 1 (0x1), region = 70 }

// kernel: residual_block_forward.4
= control target key start
LH: loop header
LB: loop body
LE: loop exit
PB: predicated region body
PF: predicated region fallthrough
CT: control target
= control target key end

     0   :  { %s754_s15 = smov 0   ;;  %s756_s16 = smov 0   ;;  %s807_s0 = inlined_call_operand.vmem [shape: bf16[128,36], index: 0, kind: input, shape index: {}]   ;;  %s808_s1 = inlined_call_operand.vmem [shape: bf16[36,128], index: 1, kind: input, shape index: {}]   ;;  %s809_s2 = inlined_call_operand.vmem [shape: bf16[128,128], index: 2, kind: output, shape index: {0}]   ;;  %s810_s3 = inlined_call_operand.vmem [shape: f32[16,128], index: 3, kind: output, shape index: {1}]   ;;  %s811_s4 = inlined_call_operand.vmem [shape: f32[16,128], index: 4, kind: output, shape index: {2}]  }
   0x1   :  { %s758_s17 = smov 0  }
   0x2 LB: > { %s27_s18 = sadd.s32 1, %s723_s16  ;;  %p585_p0 = scmp.ge.s32.totalorder %s727_s17, 1  ;;  %s727_s17 = sphi %s758_s17, %s15_s17   ;;  %s723_s16 = sphi %s756_s16, %s813_s16   ;;  %s719_s15 = sphi %s754_s15, %s812_s15  }
   0x3   : > { %p29_p1 = scmp.ge.s32.totalorder %s27_s18, 2  ;;  %p186_p2 = scmp.lt.s32.totalorder %s727_s17, 3 }
   0x5   : > { %s815_s18 = smov (%p29_p1, %s27_s18), 0  ;;  %p187_p3 = pnand %p585_p0, %p186_p2 }
   0x6   : > { %v698_v0 = vld [vmem:[%s808_s1] sm:$0xff] (!%p187_p3)   ;;  %v699_v1 = vld [vmem:[%s808_s1 + $0x8] sm:$0xff] (!%p187_p3)   ;;  %s586_s23 = sshll.u32 (!%p187_p3), %s719_s15, 3  ;;  %v700_v2 = vld [vmem:[%s808_s1 + $0x10] ss:$0 sps:$4 sm:$0x33] (!%p187_p3)  }
   0x7   : > { %190 = sbr.rel (%p187_p3) target bundleno = 251 (0xfb), region = 28  ;;  %651 = vmatprep.subr.bf16.mxu0 (!%p187_p3), %v698_v0  ;;  %665 = vmatprep.subr.bf16.mxu1 (!%p187_p3), %v698_v0  ;;  %p224_p4 = scmp.lt.s32.totalorder (!%p187_p3), %s586_s23, 15  ;;  %vm314_vm0 = vcmask (!%p187_p3), 1041408   ;;  %vm301_vm1 = vcmask (!%p187_p3), 293888  }
   0x8   : > { %652 = vmatpush3.bf16.msra.mxu0 (!%p187_p3), %v698_v0  ;;  %668 = vmatpush3.bf16.msra.mxu1 (!%p187_p3), %v698_v0  ;;  %v316_v3 = vsel (!%p187_p3), %vm314_vm0, %v700_v2, 0  ;;  %p238_p5 = scmp.lt.s32.totalorder (!%p187_p3), %s719_s15, 1 }
   0x9   : > { %653 = vmatprep.subr.bf16.mxu0 (!%p187_p3), %v699_v1  ;;  %666 = vmatprep.subr.bf16.mxu1 (!%p187_p3), %v699_v1 }
   0xc   : > { %654 = vmatpush3.bf16.msra.mxu0 (!%p187_p3), %v699_v1  ;;  %669 = vmatpush3.bf16.msra.mxu1 (!%p187_p3), %v699_v1 }
   0xd   : > { %671 = vmatprep.subr.msk.bf16.mxu0 (!%p187_p3), %vm314_vm0, %v700_v2  ;;  %672 = vmatprep.subr.msk.bf16.mxu1 (!%p187_p3), %vm314_vm0, %v700_v2 }
   0xe   : > { %s817_s23 = smov (!%p224_p4, %s586_s23), 15  ;;  %s819_s15 = smov (!%p238_p5, %s719_s15), 1 }
   0xf   : > { %s587_s26 = sshll.u32 %s817_s23, 2  ;;  %s590_s7 = sshll.u32 %s819_s15, 3 }
  0x10   : > { %s227_s29 = scalar_lea.vmem %s807_s0, %s587_s26  ;;  %656 = vmatpush3.bf16.msra.mxu0 %v316_v3  ;;  %670 = vmatpush3.bf16.msra.mxu1 %v316_v3  ;;  %s235_s6 = scalar_lea.vmem %s809_s2, %s587_s26 }
  0x11   : > { %v701_v4 = vld [vmem:[%s227_s29] sm:$0xff]   ;;  %v702_v5 = vld [vmem:[%s227_s29 + $0x8] sm:$0xff]   ;;  %v703_v6 = vld [vmem:[%s227_s29 + $0x10] sm:$0xff]   ;;  %s241_s10 = scalar_lea.vmem %s810_s3, %s590_s7  ;;  %s245_s13 = scalar_lea.vmem %s811_s4, %s590_s7 }
  0x12   : > { %657 = vmatprep.mubr.msk.bf16.mxu0 %vm301_vm1, %v701_v4  ;;  %v704_v7 = vld [vmem:[%s227_s29 + $0x18] sm:$0xff]   ;;  %661 = vmatprep.mubr.msk.bf16.mxu1 %vm301_vm1, %v703_v6 }
  0x13   : > { %658 = vmatmul.mubr.msk.bf16.vlgmr.msra.gmra.mrb[0].mxu0 %vm301_vm1, %v702_v5  ;;  %662 = vmatmul.mubr.msk.bf16.vlgmr.msra.gmra.mrb[0].mxu1 %vm301_vm1, %v704_v7 }
  0xe6   : > { %v659_v8 = vpop.f32.mrb[0].mxu0  ;;  %v663_v9 = vpop.f32.mrb[0].mxu1 }
  0xe7   : > { %v352_v10 = vpop.f32.mrb[1].mxu0  ;;  %v368_v11 = vpop.f32.mrb[1].mxu1  ;;  %v436_v23 = vmul.f32 %v659_v8, %v659_v8  ;;  %v440_v35 = vmul.f32 %v663_v9, %v663_v9 }
  0xe8   : > { %v660_v12 = vpop.f32.mrb[2].mxu0  ;;  %v664_v13 = vpop.f32.mrb[2].mxu1  ;;  %v434_v14 = vmul.f32 %v352_v10, %v352_v10  ;;  %v438_v29 = vmul.f32 %v368_v11, %v368_v11 }
  0xe9   : > { %v629_v15 = vpack.c.bf16 %v660_v12, %v659_v8  ;;  %v355_v16 = vpop.f32.mrb[3].mxu0  ;;  %v639_v17 = vpack.c.bf16 %v664_v13, %v663_v9  ;;  %v371_v18 = vpop.f32.mrb[3].mxu1  ;;  %v437_v26 = vmul.f32 %v660_v12, %v660_v12  ;;  %v441_v38 = vmul.f32 %v664_v13, %v664_v13 }
  0xea   : > { %v624_v19 = vpack.c.bf16 %v355_v16, %v352_v10  ;;  %v424_v20 = vadd.f32 %v355_v16, %v352_v10  ;;  %v435_v21 = vmul.f32 %v355_v16, %v355_v16  ;;  %v634_v22 = vpack.c.bf16 %v371_v18, %v368_v11 }
  0xeb   : > { %641 = vst [vmem:[%s235_s6 + $0x8] sm:$0xff] %v629_v15   ;;  %643 = vst [vmem:[%s235_s6 + $0x18] sm:$0xff] %v639_v17   ;;  %v439_v34 = vmul.f32 %v371_v18, %v371_v18 }
  0xec   : > { %625 = vst [vmem:[%s235_s6] sm:$0xff] %v624_v19   ;;  %v425_v24 = vadd.f32 %v659_v8, %v424_v20  ;;  %v442_v25 = vadd.f32 %v435_v21, %v434_v14  ;;  %642 = vst [vmem:[%s235_s6 + $0x10] sm:$0xff] %v634_v22  }
  0xee   : > { %v443_v27 = vadd.f32 %v442_v25, %v436_v23  ;;  %v426_v28 = vadd.f32 %v660_v12, %v425_v24 }
  0xf0   : > { %v427_v30 = vadd.f32 %v426_v28, %v368_v11  ;;  %v444_v31 = vadd.f32 %v443_v27, %v437_v26 }
  0xf2   : > { %v445_v32 = vadd.f32 %v444_v31, %v438_v29  ;;  %v428_v33 = vadd.f32 %v427_v30, %v371_v18 }
  0xf4   : > { %v429_v36 = vadd.f32 %v663_v9, %v428_v33  ;;  %v446_v37 = vadd.f32 %v445_v32, %v439_v34 }
  0xf6   : > { %v430_v39 = vadd.f32 %v664_v13, %v429_v36  ;;  %v447_v40 = vadd.f32 %v446_v37, %v440_v35 }
  0xf8   : > { %v448_v41 = vadd.f32 %v447_v40, %v441_v38  ;;  %432 = vst [vmem:[%s241_s10] sm:$0xff] %v430_v39 }
  0xfa   : > { %450 = vst [vmem:[%s245_s13] sm:$0xff] %v448_v41 }
  0xfb PF: > { %s15_s17 = sadd.s32 1, %s727_s17   ;;  %s812_s15 = smov %s723_s16 }
  0xfc   : > { %p12_p6 = scmp.ge.s32.totalorder %s15_s17, 4   ;;  %s813_s16 = smov %s815_s18 }
  0xfe   :  { %14 = sbr.rel (!%p12_p6) target bundleno = 2 (0x2), region = 86 }

// kernel: residual_block_forward.7
= control target key start
LH: loop header
LB: loop body
LE: loop exit
PB: predicated region body
PF: predicated region fallthrough
CT: control target
= control target key end

     0   :  { %s751_s13 = smov 0   ;;  %s821_s0 = inlined_call_operand.vmem [shape: bf16[128,128], index: 0, kind: input, shape index: {}]   ;;  %s822_s1 = inlined_call_operand.vmem [shape: f32[16,128], index: 1, kind: input, shape index: {}]   ;;  %s823_s2 = inlined_call_operand.vmem [shape: f32[16,128], index: 2, kind: input, shape index: {}]   ;;  %s824_s3 = inlined_call_operand.vmem [shape: f32[1,128], index: 3, kind: input, shape index: {}]   ;;  %s825_s4 = inlined_call_operand.vmem [shape: f32[1,128], index: 4, kind: input, shape index: {}]   ;;  %s826_s5 = inlined_call_operand.vmem [shape: bf16[128,128], index: 5, kind: input, shape index: {}]   ;;  %s827_s6 = inlined_call_operand.vmem [shape: f32[16,128], index: 6, kind: input, shape index: {}]   ;;  %s828_s7 = inlined_call_operand.vmem [shape: f32[16,128], index: 7, kind: input, shape index: {}]   ;;  %s829_s8 = inlined_call_operand.vmem [shape: f32[1,128], index: 8, kind: input, shape index: {}]   ;;  %s830_s9 = inlined_call_operand.vmem [shape: f32[1,128], index: 9, kind: input, shape index: {}]   ;;  %s831_s10 = inlined_call_operand.vmem [shape: f32[128,128], index: 10, kind: output, shape index: {}]  }
   0x1 LB: > { %s625_s14 = sadd.s32 4294967295, %s694_s13   ;;  %p629_p0 = scmp.ge.s32.totalorder %s694_s13, 1  ;;  %s694_s13 = sphi %s751_s13, %s20_s13  }
   0x2   : > { %p324_p1 = scmp.lt.s32.totalorder %s694_s13, 3 }
   0x4   : > { %p325_p2 = pnand %p629_p0, %p324_p1 }
   0x5   : > { %v393_v0 = vld [vmem:[%s822_s1] sm:$0xff] (!%p325_p2)  ;;  %v394_v1 = vld [vmem:[%s822_s1 + $0x8] sm:$0xff] (!%p325_p2)  ;;  %s630_s11 = sshll.u32 (!%p325_p2), %s625_s14, 3  ;;  %v432_v48 = vlaneseq (!%p325_p2) }
   0x6   : > { %328 = sbr.rel (%p325_p2) target bundleno = 66 (0x42), region = 60  ;;  %v395_v2 = vld [vmem:[%s823_s2] sm:$0xff] (!%p325_p2)  ;;  %v396_v3 = vld [vmem:[%s823_s2 + $0x8] sm:$0xff] (!%p325_p2)  ;;  %v399_v4 = vadd.f32 (!%p325_p2), %v394_v1, %v393_v0  ;;  %p368_p3 = scmp.lt.s32.totalorder (!%p325_p2), %s630_s11, 15 }
   0x7   : > { %v406_v5 = vadd.f32 (!%p325_p2), %v396_v3, %v395_v2  ;;  %v467_v6 = vld [vmem:[%s827_s6] sm:$0xff] (!%p325_p2)  ;;  %v468_v7 = vld [vmem:[%s827_s6 + $0x8] sm:$0xff] (!%p325_p2)  ;;  %v433_v49 = vshrl.u32 (!%p325_p2), %v432_v48, 7 }
   0x8   : > { %v469_v8 = vld [vmem:[%s828_s7] sm:$0xff] (!%p325_p2)  ;;  %v400_v9 = vrot.slane (!%p325_p2), %v399_v4, 4  ;;  %v470_v10 = vld [vmem:[%s828_s7 + $0x8] sm:$0xff] (!%p325_p2)  ;;  %v473_v11 = vadd.f32 (!%p325_p2), %v468_v7, %v467_v6 }
   0x9   : > { %v407_v12 = vrot.slane (!%p325_p2), %v406_v5, 4  ;;  %v480_v13 = vadd.f32 (!%p325_p2), %v470_v10, %v469_v8  ;;  %v397_v52 = vld [vmem:[%s824_s3] sm:$0x1] (!%p325_p2)  ;;  %v434_v55 = vsub.s32 (!%p325_p2), 0, %v433_v49 }
   0xa   : > { %v401_v14 = vadd.f32 (!%p325_p2), %v400_v9, %v399_v4  ;;  %v474_v15 = vrot.slane (!%p325_p2), %v473_v11, 4  ;;  %v471_v61 = vld [vmem:[%s829_s8] sm:$0x1] (!%p325_p2) }
   0xb   : > { %v408_v16 = vadd.f32 (!%p325_p2), %v407_v12, %v406_v5  ;;  %v481_v17 = vrot.slane (!%p325_p2), %v480_v13, 4  ;;  %v398_v7 = vld [vmem:[%s825_s4] sm:$0x1] (!%p325_p2) }
   0xc   : > { %v402_v18 = vrot.slane (!%p325_p2), %v401_v14, 2  ;;  %v475_v19 = vadd.f32 (!%p325_p2), %v474_v15, %v473_v11 }
   0xd   : > { %v409_v20 = vrot.slane %v408_v16, 2  ;;  %v482_v21 = vadd.f32 %v481_v17, %v480_v13  ;;  %s833_s11 = smov (!%p368_p3, %s630_s11), 15 }
   0xe   : > { %v403_v22 = vadd.f32 %v402_v18, %v401_v14  ;;  %v476_v23 = vrot.slane %v475_v19, 2  ;;  %s631_s12 = sshll.u32 %s833_s11, 2  ;;  %s635_s28 = sshll.u32 %s833_s11, 3 }
   0xf   : > { %v410_v24 = vadd.f32 %v409_v20, %v408_v16  ;;  %v483_v25 = vrot.slane %v482_v21, 2  ;;  %s371_s16 = scalar_lea.vmem %s821_s0, %s631_s12  ;;  %s377_s19 = scalar_lea.vmem %s826_s5, %s631_s12  ;;  %v472_v16 = vld [vmem:[%s830_s9] sm:$0x1] }
  0x10   : > { %v404_v26 = vrot.slane %v403_v22, 1  ;;  %v477_v27 = vadd.f32 %v476_v23, %v475_v19  ;;  %v639_v50 = vld [vmem:[%s371_s16] sm:$0xff]   ;;  %v670_v53 = vld [vmem:[%s371_s16 + $0x8] sm:$0xff]   ;;  %v671_v56 = vld [vmem:[%s371_s16 + $0x10] sm:$0xff]   ;;  %s383_s12 = scalar_lea.vmem %s831_s10, %s635_s28 }
  0x11   : > { %v411_v28 = vrot.slane %v410_v24, 1  ;;  %v484_v29 = vadd.f32 %v483_v25, %v482_v21  ;;  %v655_v51 = vld [vmem:[%s377_s19] sm:$0xff]   ;;  %v673_v54 = vld [vmem:[%s377_s19 + $0x8] sm:$0xff]   ;;  %v674_v57 = vld [vmem:[%s377_s19 + $0x10] sm:$0xff]   ;;  %v640_v59 = vunpack.c.l.bf16 %v639_v50  ;;  %v641_v62 = vunpack.c.h.bf16 %v639_v50 }
  0x12   : > { %v405_v30 = vadd.f32 %v404_v26, %v403_v22  ;;  %v478_v31 = vrot.slane %v477_v27, 1  ;;  %v656_v60 = vunpack.c.l.bf16 %v655_v51  ;;  %v657_v63 = vunpack.c.h.bf16 %v655_v51  ;;  %v800_v4 = vld [vmem:[%s371_s16 + $0x18] sm:$0xff]  }
  0x13   : > { %v412_v32 = vadd.f32 %v411_v28, %v410_v24  ;;  %v485_v33 = vrot.slane %v484_v29, 1  ;;  %v644_v1 = vunpack.c.l.bf16 %v670_v53  ;;  %v660_v2 = vunpack.c.l.bf16 %v673_v54  ;;  %v802_v5 = vld [vmem:[%s377_s19 + $0x18] sm:$0xff]  }
  0x14   : > { %v413_v34 = vmul.f32 0.0078125, %v405_v30  ;;  %v479_v35 = vadd.f32 %v478_v31, %v477_v27  ;;  %v645_v3 = vunpack.c.h.bf16 %v670_v53  ;;  %v661_v8 = vunpack.c.h.bf16 %v673_v54 }
  0x15   : > { %v414_v36 = vmul.f32 0.0078125, %v412_v32  ;;  %v486_v37 = vadd.f32 %v485_v33, %v484_v29  ;;  %v648_v9 = vunpack.c.l.bf16 %v671_v56  ;;  %v664_v10 = vunpack.c.l.bf16 %v674_v57 }
  0x16   : > { %v415_v38 = vmul.f32 %v413_v34, %v413_v34  ;;  %v487_v39 = vmul.f32 0.0078125, %v479_v35  ;;  %v649_v11 = vunpack.c.h.bf16 %v671_v56  ;;  %v665_v15 = vunpack.c.h.bf16 %v674_v57 }
  0x17   : > { %v488_v40 = vmul.f32 0.0078125, %v486_v37  ;;  %v652_v17 = vunpack.c.l.bf16 %v800_v4  ;;  %v668_v18 = vunpack.c.l.bf16 %v802_v5  ;;  %v653_v19 = vunpack.c.h.bf16 %v800_v4 }
  0x18   : > { %v416_v41 = vsub.f32 %v414_v36, %v415_v38  ;;  %v489_v42 = vmul.f32 %v487_v39, %v487_v39  ;;  %v669_v20 = vunpack.c.h.bf16 %v802_v5 }
  0x1a   : > { %v417_v43 = vmax.f32 %v416_v41, 0.0  ;;  %v490_v44 = vsub.f32 %v488_v40, %v489_v42 }
  0x1c   : > { %v418_v45 = vadd.f32 1e-05, %v417_v43  ;;  %v491_v46 = vmax.f32 %v490_v44, 0.0 }
  0x1e   : > { %684 = vrsqrt.f32 %v418_v45  ;;  %v492_v47 = vadd.f32 1e-05, %v491_v46 }
  0x20   : > { %686 = vrsqrt.f32 %v492_v47 }
  0x28   : > { %v685_v58 = vpop.eup %684 }
  0x29   : > { %v420_v0 = vmul.f32 %v685_v58, %v397_v52 }
  0x2a   : > { %v687_v6 = vpop.eup %686 }
  0x2b   : > { %v421_v12 = vmul.f32 %v420_v0, %v413_v34  ;;  %v435_v13 = vrot.slane %v420_v0, %v434_v55  ;;  %v494_v14 = vmul.f32 %v687_v6, %v471_v61 }
  0x2d   : > { %v422_v21 = vsub.f32 %v398_v7, %v421_v12  ;;  %v437_v22 = vmul.f32 %v640_v59, %v435_v13  ;;  %v495_v23 = vmul.f32 %v494_v14, %v487_v39  ;;  %v509_v24 = vrot.slane %v494_v14, %v434_v55 }
  0x2e   : > { %v438_v25 = vmul.f32 %v641_v62, %v435_v13  ;;  %v439_v26 = vmul.f32 %v644_v1, %v435_v13  ;;  %v440_v27 = vmul.f32 %v645_v3, %v435_v13  ;;  %v441_v28 = vmul.f32 %v648_v9, %v435_v13 }
  0x2f   : > { %v449_v29 = vrot.slane %v422_v21, %v434_v55  ;;  %v496_v30 = vsub.f32 %v472_v16, %v495_v23  ;;  %v511_v31 = vmul.f32 %v656_v60, %v509_v24  ;;  %v512_v32 = vmul.f32 %v657_v63, %v509_v24 }
  0x30   : > { %v513_v33 = vmul.f32 %v660_v2, %v509_v24  ;;  %v514_v34 = vmul.f32 %v661_v8, %v509_v24  ;;  %v515_v35 = vmul.f32 %v664_v10, %v509_v24  ;;  %v442_v36 = vmul.f32 %v649_v11, %v435_v13 }
  0x31   : > { %v451_v37 = vadd.f32 %v449_v29, %v437_v22  ;;  %v523_v38 = vrot.slane %v496_v30, %v434_v55  ;;  %v452_v40 = vadd.f32 %v449_v29, %v438_v25  ;;  %v453_v41 = vadd.f32 %v449_v29, %v439_v26 }
  0x32   : > { %v454_v42 = vadd.f32 %v449_v29, %v440_v27  ;;  %v455_v39 = vadd.f32 %v449_v29, %v441_v28  ;;  %v456_v43 = vadd.f32 %v449_v29, %v442_v36  ;;  %v516_v44 = vmul.f32 %v665_v15, %v509_v24 }
  0x33   : > { %v525_v45 = vadd.f32 %v523_v38, %v511_v31  ;;  %v526_v46 = vadd.f32 %v523_v38, %v512_v32  ;;  %v527_v47 = vadd.f32 %v523_v38, %v513_v33  ;;  %v528_v48 = vadd.f32 %v523_v38, %v514_v34 }
  0x34   : > { %v529_v49 = vadd.f32 %v523_v38, %v515_v35  ;;  %v530_v50 = vadd.f32 %v523_v38, %v516_v44  ;;  %v443_v51 = vmul.f32 %v652_v17, %v435_v13  ;;  %v517_v52 = vmul.f32 %v668_v18, %v509_v24 }
  0x35   : > { %v533_v53 = vadd.f32 %v525_v45, %v451_v37  ;;  %v534_v54 = vadd.f32 %v526_v46, %v452_v40  ;;  %v535_v56 = vadd.f32 %v527_v47, %v453_v41  ;;  %v536_v57 = vadd.f32 %v528_v48, %v454_v42 }
  0x36   : > { %v537_v55 = vadd.f32 %v529_v49, %v455_v39  ;;  %v538_v58 = vadd.f32 %v530_v50, %v456_v43  ;;  %v457_v59 = vadd.f32 %v449_v29, %v443_v51  ;;  %v531_v60 = vadd.f32 %v523_v38, %v517_v52 }
  0x37   : > { %v541_v61 = vmax.f32 %v533_v53, 0.0  ;;  %v542_v62 = vmax.f32 %v534_v54, 0.0  ;;  %v543_v63 = vmax.f32 %v535_v56, 0.0  ;;  %v544_v0 = vmax.f32 %v536_v57, 0.0 }
  0x38   : > { %v545_v1 = vmax.f32 %v537_v55, 0.0  ;;  %v546_v2 = vmax.f32 %v538_v58, 0.0  ;;  %v539_v3 = vadd.f32 %v531_v60, %v457_v59  ;;  %v444_v4 = vmul.f32 %v653_v19, %v435_v13 }
  0x39   : > { %549 = vst [vmem:[%s383_s12] sm:$0xff] %v541_v61  ;;  %550 = vst [vmem:[%s383_s12 + $0x8] sm:$0xff] %v542_v62  ;;  %v518_v5 = vmul.f32 %v669_v20, %v509_v24 }
  0x3a   : > { %551 = vst [vmem:[%s383_s12 + $0x10] sm:$0xff] %v543_v63  ;;  %552 = vst [vmem:[%s383_s12 + $0x18] sm:$0xff] %v544_v0  ;;  %v547_v6 = vmax.f32 %v539_v3, 0.0  ;;  %v458_v7 = vadd.f32 %v449_v29, %v444_v4 }
  0x3b   : > { %553 = vst [vmem:[%s383_s12 + $0x20] sm:$0xff] %v545_v1  ;;  %554 = vst [vmem:[%s383_s12 + $0x28] sm:$0xff] %v546_v2  ;;  %v532_v8 = vadd.f32 %v523_v38, %v518_v5 }
  0x3c   : > { %555 = vst [vmem:[%s383_s12 + $0x30] sm:$0xff] %v547_v6 }
  0x3d   : > { %v540_v9 = vadd.f32 %v532_v8, %v458_v7 }
  0x3f   : > { %v548_v10 = vmax.f32 %v540_v9, 0.0 }
  0x41   : > { %556 = vst [vmem:[%s383_s12 + $0x38] sm:$0xff] %v548_v10 }
  0x42 PF: > { %s20_s13 = sadd.s32 1, %s694_s13  }
  0x43   : > { %p17_p4 = scmp.ge.s32.totalorder %s20_s13, 4  }
  0x45   :  { %19 = sbr.rel (!%p17_p4) target bundleno = 1 (0x1), region = 93 }

// kernel: residual_block_forward.6
= control target key start
LH: loop header
LB: loop body
LE: loop exit
PB: predicated region body
PF: predicated region fallthrough
CT: control target
= control target key end

     0   :  { %s1365_s30 = smov 0   ;;  %s1367_s10 = smov 0   ;;  %s1471_s0 = inlined_call_operand.vmem [shape: bf16[128,72], index: 0, kind: input, shape index: {}]   ;;  %s1472_s1 = inlined_call_operand.vmem [shape: bf16[72,128], index: 1, kind: input, shape index: {}]   ;;  %s1473_s2 = inlined_call_operand.vmem [shape: bf16[128,4], index: 2, kind: input, shape index: {}]   ;;  %s1474_s3 = inlined_call_operand.vmem [shape: bf16[4,128], index: 3, kind: input, shape index: {}]   ;;  %s1475_s4 = inlined_call_operand.vmem [shape: bf16[128,128], index: 4, kind: output, shape index: {0}]   ;;  %s1476_s5 = inlined_call_operand.vmem [shape: f32[16,128], index: 5, kind: output, shape index: {1}]   ;;  %s1477_s6 = inlined_call_operand.vmem [shape: f32[16,128], index: 6, kind: output, shape index: {2}]   ;;  %s1478_s7 = inlined_call_operand.vmem [shape: bf16[128,128], index: 7, kind: output, shape index: {3}]   ;;  %s1479_s8 = inlined_call_operand.vmem [shape: f32[16,128], index: 8, kind: output, shape index: {4}]   ;;  %s1480_s9 = inlined_call_operand.vmem [shape: f32[16,128], index: 9, kind: output, shape index: {5}]  }
   0x1   :  { %s1369_s11 = smov 0  }
   0x2 LB: > { %s32_s12 = sadd.s32 1, %s1309_s10  ;;  %p1095_p0 = scmp.ge.s32.totalorder %s1313_s11, 1  ;;  %s1313_s11 = sphi %s1369_s11, %s20_s11   ;;  %s1309_s10 = sphi %s1367_s10, %s1482_s10   ;;  %s1305_s30 = sphi %s1365_s30, %s1481_s30  }
   0x3   : > { %p34_p1 = scmp.ge.s32.totalorder %s32_s12, 2  ;;  %p334_p2 = scmp.lt.s32.totalorder %s1313_s11, 3 }
   0x5   : > { %s1484_s12 = smov (%p34_p1, %s32_s12), 0  ;;  %p335_p3 = pnand %p1095_p0, %p334_p2 }
   0x6   : > { %v1278_v0 = vld [vmem:[%s1472_s1] sm:$0xff] (!%p335_p3)   ;;  %vm713_vm0 = vcmask (!%p335_p3), 1041408   ;;  %v1279_v1 = vld [vmem:[%s1472_s1 + $0x8] sm:$0xff] (!%p335_p3)   ;;  %s1096_s17 = sshll.u32 (!%p335_p3), %s1305_s30, 3  ;;  %v1280_v3 = vld [vmem:[%s1472_s1 + $0x10] sm:$0xff] (!%p335_p3)   ;;  %vm700_vm1 = vcmask (!%p335_p3), 31744  }
   0x7   : > { %338 = sbr.rel (%p335_p3) target bundleno = 260 (0x104), region = 36  ;;  %1223 = vmatprep.subr.bf16.mxu0 (!%p335_p3), %v1278_v0  ;;  %p402_p4 = scmp.lt.s32.totalorder (!%p335_p3), %s1096_s17, 15  ;;  %v679_v2 = vld [vmem:[%s1474_s3] sm:$0x3] (!%p335_p3)  ;;  %v1281_v5 = vld [vmem:[%s1472_s1 + $0x18] sm:$0xff] (!%p335_p3)   ;;  %vm521_vm2 = vcmask (!%p335_p3), 588800  }
   0x8   : > { %1224 = vmatpush3.bf16.msra.mxu0 (!%p335_p3), %v1278_v0  ;;  %1252 = vmatprep.subr.msk.bf16.mxu1 (!%p335_p3), %vm713_vm0, %v679_v2  ;;  %v715_v4 = vsel (!%p335_p3), %vm713_vm0, %v679_v2, 0  ;;  %v1284_v9 = vld [vmem:[%s1472_s1 + $0x20] ss:$0 sps:$4 sm:$0xff] (!%p335_p3)   ;;  %vm534_vm3 = vcmask (!%p335_p3), 1043456   ;;  %p424_p5 = scmp.lt.s32.totalorder (!%p335_p3), %s1305_s30, 1 }
   0x9   : > { %1225 = vmatprep.subr.bf16.mxu0 (!%p335_p3), %v1279_v1  ;;  %1242 = vmatpush3.bf16.msra.mxu1 (!%p335_p3), %v715_v4  ;;  %v536_v12 = vsel (!%p335_p3), %vm534_vm3, %v1284_v9, 0 }
   0xc   : > { %1226 = vmatpush3.bf16.msra.mxu0 (!%p335_p3), %v1279_v1 }
   0xd   : > { %1227 = vmatprep.subr.bf16.mxu0 (!%p335_p3), %v1280_v3 }
   0xe   : > { %s1486_s17 = smov (!%p402_p4, %s1096_s17), 15  ;;  %s1488_s30 = smov (!%p424_p5, %s1305_s30), 1 }
   0xf   : > { %s1398_s22 = sshll.u32 %s1486_s17, 2  ;;  %s1439_s23 = sshll.u32 %s1488_s30, 3 }
  0x10   : > { %s413_s27 = scalar_lea.vmem %s1473_s2, %s1398_s22  ;;  %s405_s13 = scalar_lea.vmem %s1471_s0, %s1398_s22  ;;  %1228 = vmatpush3.bf16.msra.mxu0 %v1280_v3 }
  0x11   : > { %v1282_v6 = vld [vmem:[%s413_s27] sm:$0xff]   ;;  %v1283_v7 = vld [vmem:[%s413_s27 + $0x8] sm:$0xff]   ;;  %1229 = vmatprep.subr.bf16.mxu0 %v1281_v5  ;;  %v1287_v10 = vld [vmem:[%s413_s27 + $0x10] sm:$0xff]   ;;  %s1426_s18 = scalar_lea.vmem %s1478_s7, %s1398_s22  ;;  %s1436_s21 = scalar_lea.vmem %s1475_s4, %s1398_s22 }
  0x12   : > { %1243 = vmatprep.mubr.msk.bf16.mxu1 %vm700_vm1, %v1282_v6  ;;  %v1285_v8 = vld [vmem:[%s405_s13] sm:$0xff]   ;;  %v1288_v11 = vld [vmem:[%s413_s27 + $0x18] sm:$0xff]   ;;  %v1286_v13 = vld [vmem:[%s405_s13 + $0x8] sm:$0xff]   ;;  %s443_s25 = scalar_lea.vmem %s1479_s8, %s1439_s23  ;;  %s447_s27 = scalar_lea.vmem %s1480_s9, %s1439_s23 }
  0x13   : > { %1244 = vmatmul.mubr.msk.bf16.vlgmr.msra.gmra.mrb[0].mxu1 %vm700_vm1, %v1283_v7  ;;  %1233 = vmatprep.mubr.msk.bf16.mxu0 %vm521_vm2, %v1285_v8  ;;  %v1289_v14 = vld [vmem:[%s405_s13 + $0x10] sm:$0xff]   ;;  %v1290_v15 = vld [vmem:[%s405_s13 + $0x18] sm:$0xff]   ;;  %s427_s13 = scalar_lea.vmem %s1476_s5, %s1439_s23  ;;  %s431_s16 = scalar_lea.vmem %s1477_s6, %s1439_s23 }
  0x14   : > { %1247 = vmatprep.mubr.msk.bf16.mxu1 %vm700_vm1, %v1287_v10  ;;  %1230 = vmatpush3.bf16.msra.mxu0 %v1281_v5 }
  0x15   : > { %1251 = vmatprep.subr.msk.bf16.mxu0 %vm534_vm3, %v1284_v9 }
  0x18   : > { %1232 = vmatpush3.bf16.msra.mxu0 %v536_v12 }
  0x1b   : > { %1248 = vmatmul.mubr.msk.bf16.gmra.mrb[4].mxu1 %vm700_vm1, %v1288_v11  ;;  %1234 = vmatmul.mubr.msk.bf16.vlgmr.msra.gmra.mrb[0].mxu0 %vm521_vm2, %v1286_v13 }
  0x1c   : > { %1237 = vmatprep.mubr.msk.bf16.mxu0 %vm521_vm2, %v1289_v14 }
  0x23   : > { %1238 = vmatmul.mubr.msk.bf16.gmra.mrb[4].mxu0 %vm521_vm2, %v1290_v15 }
  0xe6   : > { %v1245_v16 = vpop.f32.mrb[0].mxu1 }
  0xe7   : > { %v751_v17 = vpop.f32.mrb[1].mxu1  ;;  %v835_v22 = vmul.f32 %v1245_v16, %v1245_v16 }
  0xe8   : > { %v833_v18 = vmul.f32 %v751_v17, %v751_v17  ;;  %v1246_v19 = vpop.f32.mrb[2].mxu1 }
  0xe9   : > { %v1191_v20 = vpack.c.bf16 %v1246_v19, %v1245_v16  ;;  %v754_v21 = vpop.f32.mrb[3].mxu1  ;;  %v836_v26 = vmul.f32 %v1246_v19, %v1246_v19 }
  0xea   : > { %v1186_v23 = vpack.c.bf16 %v754_v21, %v751_v17  ;;  %v823_v24 = vadd.f32 %v754_v21, %v751_v17  ;;  %v834_v25 = vmul.f32 %v754_v21, %v754_v21 }
  0xeb   : > { %1206 = vst [vmem:[%s1426_s18 + $0x8] sm:$0xff] %v1191_v20  }
  0xec   : > { %1187 = vst [vmem:[%s1426_s18] sm:$0xff] %v1186_v23   ;;  %v824_v27 = vadd.f32 %v1245_v16, %v823_v24  ;;  %v841_v28 = vadd.f32 %v834_v25, %v833_v18 }
  0xee   : > { %v842_v29 = vadd.f32 %v841_v28, %v835_v22  ;;  %v1249_v30 = vpop.f32.mrb[4].mxu1  ;;  %v825_v31 = vadd.f32 %v1246_v19, %v824_v27  ;;  %v1235_v37 = vpop.f32.mrb[0].mxu0 }
  0xef   : > { %v767_v32 = vpop.f32.mrb[5].mxu1  ;;  %v572_v40 = vpop.f32.mrb[1].mxu0  ;;  %v839_v44 = vmul.f32 %v1249_v30, %v1249_v30  ;;  %v656_v57 = vmul.f32 %v1235_v37, %v1235_v37 }
  0xf0   : > { %v826_v33 = vadd.f32 %v825_v31, %v767_v32  ;;  %v837_v34 = vmul.f32 %v767_v32, %v767_v32  ;;  %v843_v35 = vadd.f32 %v842_v29, %v836_v26  ;;  %v1250_v36 = vpop.f32.mrb[6].mxu1  ;;  %v1236_v45 = vpop.f32.mrb[2].mxu0  ;;  %v654_v47 = vmul.f32 %v572_v40, %v572_v40 }
  0xf1   : > { %v1201_v38 = vpack.c.bf16 %v1250_v36, %v1249_v30  ;;  %v770_v39 = vpop.f32.mrb[7].mxu1  ;;  %v1171_v48 = vpack.c.bf16 %v1236_v45, %v1235_v37  ;;  %v575_v49 = vpop.f32.mrb[3].mxu0  ;;  %v840_v50 = vmul.f32 %v1250_v36, %v1250_v36  ;;  %v657_v61 = vmul.f32 %v1236_v45, %v1236_v45 }
  0xf2   : > { %v844_v41 = vadd.f32 %v843_v35, %v837_v34  ;;  %v1196_v42 = vpack.c.bf16 %v770_v39, %v767_v32  ;;  %v827_v43 = vadd.f32 %v826_v33, %v770_v39  ;;  %v838_v46 = vmul.f32 %v770_v39, %v770_v39 }
  0xf3   : > { %1208 = vst [vmem:[%s1426_s18 + $0x18] sm:$0xff] %v1201_v38   ;;  %v1166_v52 = vpack.c.bf16 %v575_v49, %v572_v40  ;;  %v644_v53 = vadd.f32 %v575_v49, %v572_v40  ;;  %v655_v54 = vmul.f32 %v575_v49, %v575_v49  ;;  %1203 = vst [vmem:[%s1436_s21 + $0x8] sm:$0xff] %v1171_v48  }
  0xf4   : > { %1207 = vst [vmem:[%s1426_s18 + $0x10] sm:$0xff] %v1196_v42   ;;  %v828_v51 = vadd.f32 %v1249_v30, %v827_v43  ;;  %v845_v55 = vadd.f32 %v844_v41, %v838_v46 }
  0xf5   : > { %1167 = vst [vmem:[%s1436_s21] sm:$0xff] %v1166_v52   ;;  %v645_v58 = vadd.f32 %v1235_v37, %v644_v53  ;;  %v662_v59 = vadd.f32 %v655_v54, %v654_v47 }
  0xf6   : > { %v829_v56 = vadd.f32 %v1250_v36, %v828_v51  ;;  %v846_v60 = vadd.f32 %v845_v55, %v839_v44  ;;  %v1239_v0 = vpop.f32.mrb[4].mxu0 }
  0xf7   : > { %v663_v62 = vadd.f32 %v662_v59, %v656_v57  ;;  %v646_v1 = vadd.f32 %v1236_v45, %v645_v58  ;;  %v588_v2 = vpop.f32.mrb[5].mxu0  ;;  %v660_v13 = vmul.f32 %v1239_v0, %v1239_v0 }
  0xf8   : > { %v847_v63 = vadd.f32 %v846_v60, %v840_v50  ;;  %831 = vst [vmem:[%s443_s25] sm:$0xff] %v829_v56  ;;  %v658_v4 = vmul.f32 %v588_v2, %v588_v2  ;;  %v1240_v6 = vpop.f32.mrb[6].mxu0 }
  0xf9   : > { %v647_v3 = vadd.f32 %v646_v1, %v588_v2  ;;  %v664_v5 = vadd.f32 %v663_v62, %v657_v61  ;;  %v1181_v7 = vpack.c.bf16 %v1240_v6, %v1239_v0  ;;  %v591_v8 = vpop.f32.mrb[7].mxu0  ;;  %v661_v16 = vmul.f32 %v1240_v6, %v1240_v6 }
  0xfa   : > { %849 = vst [vmem:[%s447_s27] sm:$0xff] %v847_v63  ;;  %v1176_v10 = vpack.c.bf16 %v591_v8, %v588_v2  ;;  %v659_v12 = vmul.f32 %v591_v8, %v591_v8 }
  0xfb   : > { %v665_v9 = vadd.f32 %v664_v5, %v658_v4  ;;  %v648_v11 = vadd.f32 %v647_v3, %v591_v8  ;;  %1205 = vst [vmem:[%s1436_s21 + $0x18] sm:$0xff] %v1181_v7  }
  0xfc   : > { %1204 = vst [vmem:[%s1436_s21 + $0x10] sm:$0xff] %v1176_v10  }
  0xfd   : > { %v649_v14 = vadd.f32 %v1239_v0, %v648_v11  ;;  %v666_v15 = vadd.f32 %v665_v9, %v659_v12 }
  0xff   : > { %v650_v17 = vadd.f32 %v1240_v6, %v649_v14  ;;  %v667_v18 = vadd.f32 %v666_v15, %v660_v13 }
 0x101   : > { %v668_v19 = vadd.f32 %v667_v18, %v661_v16  ;;  %652 = vst [vmem:[%s427_s13] sm:$0xff] %v650_v17 }
 0x103   : > { %670 = vst [vmem:[%s431_s16] sm:$0xff] %v668_v19 }
 0x104 PF: > { %s20_s11 = sadd.s32 1, %s1313_s11   ;;  %s1481_s30 = smov %s1309_s10 }
 0x105   : > { %p17_p6 = scmp.ge.s32.totalorder %s20_s11, 4   ;;  %s1482_s10 = smov %s1484_s12 }
 0x107   :  { %19 = sbr.rel (!%p17_p6) target bundleno = 2 (0x2), region = 133 }

</bundles_post_ra>
